<compile_context>
chip_gen: v6e
topology: v6e:2x2x1
jax: 0.10.0
libtpu: 0.0.40
codegen_flags: <defaults>
</compile_context>

<pallas_src>
import functools

import numpy as np
import jax
import jax.numpy as jnp
from jax import lax
from jax.experimental import pallas as pl
from jax.experimental.pallas import tpu as pltpu

_NEG = -1e9  # bias for padded smoothing lanes: can never win max / argmax


# ----------------------------- Pallas kernels -------------------------------

def _encoder_kernel(x_ref, w_ref, b_ref, qk_ref):
    """query_encoder∘queryKeySim (folded) + key_encoder as ONE [C, 2Kd] matmul."""
    qk_ref[...] = (jnp.dot(x_ref[...], w_ref[...],
                           preferred_element_type=jnp.float32)
                   + b_ref[...]).astype(qk_ref.dtype)


def _heads_kernel(x_ref, w_ref, b_ref, o_ref):
    """cls_head + reg_head merged into a single (lane-padded) 1x1-conv matmul."""
    o_ref[...] = jnp.dot(x_ref[...], w_ref[...],
                         preferred_element_type=jnp.float32) + b_ref[...]


def _pair_fuse_kernel(tgt_ref, src_ref, outb_ref, first_ref,        # scalar prefetch
                      q_ref, k_ref, ego_ref, favg0_ref, sw_ref, sb_ref,
                      corr_ref, fused_ref,                          # outputs
                      *, hw, s_in, s_pad):
    """Per CAV pair: computeCorrespondenceVolume -> smoothing -> idx2grid +
    grid_sample + *weight + *mask -> max-fusion with the ego feature."""
    del tgt_ref, src_ref, outb_ref          # consumed by the index_maps only

    fa = q_ref[0]                           # [HW_tgt, Kd] bf16 query of ego/target
    fb = k_ref[0]                           # [HW_src, Kd] bf16 key of the source
    fa32 = fa.astype(jnp.float32)
    fb32 = fb.astype(jnp.float32)

    # -- computeCorrespondenceVolume, oriented [target, source] from the start
    #    (no transposes later); reference runs it in .half() -> bf16 on the MXU.
    g = jnp.einsum("td,sd->ts", fa, fb,
                   preferred_element_type=jnp.float32)               # [HW_t, HW_s]
    fa2 = jnp.sum(fa32 * fa32, axis=-1, keepdims=True)               # [HW_t, 1]
    fb2 = jnp.sum(fb32 * fb32, axis=-1, keepdims=True)               # [HW_s, 1]
    dist = jnp.sqrt(jnp.maximum(fa2 + fb2.T - 2.0 * g, 0.0))         # [HW_t, HW_s]

    parts = [-dist, -jnp.sqrt(fa2)]                                  # no-match col
    if s_in > hw + 1:                                                # K pad lanes
        parts.append(jnp.zeros((hw, s_in - hw - 1), jnp.float32))
    corr = jnp.concatenate(parts, axis=-1)                           # [HW_t, S_in]

    # -- smoothCorrespondenceVolume.
    # TODO(synk): SmoothingNetwork internals not provided; stand-in is one 1x1
    # conv over the (HW+1) source axis.  Weight is pre-transposed on the host;
    # padded output lanes carry bias -1e9 so they never win max/argmax.
    dec = (jnp.dot(corr.astype(jnp.bfloat16), sw_ref[...],
                   preferred_element_type=jnp.float32)
           + sb_ref[...])                                            # [HW_t, S_pad]
    corr_ref[0] = dec        # lane-dense f32 writeback; wrapper transposes once

    # -- idx2grid + F.grid_sample + *weight + *mask, fused (lane reductions).
    weight = jnp.max(dec, axis=-1, keepdims=True)                    # torch.max(..,0)[0]
    cols = lax.broadcasted_iota(jnp.int32, dec.shape, 1)
    idx = jnp.min(jnp.where(dec == weight, cols, s_pad),
                  axis=-1, keepdims=True)                            # first-occurrence argmax
    nomatch = idx == hw                                              # reference `mask`
    # NOTE: reference keeps ONLY the no-match case (warp *= mask); then the grid
    # point is (-1,-1) whose bilinear zero-padded sample is 0.25*feature[:,0,0]
    # == favg row 0.  Replicated verbatim -> no gather needed at all.
    scale = weight * nomatch.astype(jnp.float32)                     # [HW_t, 1]
    warp = scale * favg0_ref[0]                                      # [HW_t, C]

    # -- per-CAV max fusion: accumulate straight into the VMEM-resident output
    #    block (same block index for all pairs of one batch; pairs consecutive).
    p = pl.program_id(0)

    @pl.when(first_ref[p] == 1)
    def _():
        fused_ref[0] = jnp.maximum(ego_ref[0], warp)

    @pl.when(first_ref[p] == 0)
    def _():
        fused_ref[0] = jnp.maximum(fused_ref[0], warp)


# ------------------------------ call wrappers --------------------------------

def _pick_row_tile(m, target=2048):
    """Largest multiple of 16 dividing m, <= target, preferring a grid >= 2."""
    cands = [d for d in range(16, min(m, target) + 1, 16) if m % d == 0]
    if not cands:
        return m
    multi = [d for d in cands if m // d >= 2]
    return max(multi) if multi else max(cands)


def _pair_vmem_limit():
    """64 MiB on v5e/v6e (128 MiB phys); ~48 MiB on v7x (64 MiB phys)."""
    try:
        cap = int(pltpu.get_tpu_info().vmem_capacity_bytes)
    except Exception:
        cap = 128 * 1024 * 1024
    return int(min(64 * 1024 * 1024, cap * 3 // 4))


def _encode(x_rows, w_qk, b_qk):
    """Fused query/key encoder pass: [M, C] -> [M, 2*Kd] (bf16)."""
    m, c = x_rows.shape
    n2 = w_qk.shape[1]
    tm = _pick_row_tile(m)
    return pl.pallas_call(
        _encoder_kernel,
        out_shape=jax.ShapeDtypeStruct((m, n2), jnp.bfloat16),
        grid_spec=pltpu.PrefetchScalarGridSpec(
            num_scalar_prefetch=0,
            grid=(m // tm,),
            in_specs=[pl.BlockSpec((tm, c), lambda i: (i, 0)),
                      pl.BlockSpec((c, n2), lambda i: (0, 0)),
                      pl.BlockSpec((1, n2), lambda i: (0, 0))],
            out_specs=pl.BlockSpec((tm, n2), lambda i: (i, 0))),
        compiler_params=pltpu.CompilerParams(dimension_semantics=("parallel",)),
    )(x_rows, w_qk, b_qk)


def _heads(x_rows, w, b):
    """Merged cls+reg 1x1 conv: [M, C] -> [M, 128] (lane-padded, sliced outside)."""
    m, c = x_rows.shape
    nout = w.shape[1]
    tm = _pick_row_tile(m)
    return pl.pallas_call(
        _heads_kernel,
        out_shape=jax.ShapeDtypeStruct((m, nout), jnp.float32),
        grid_spec=pltpu.PrefetchScalarGridSpec(
            num_scalar_prefetch=0,
            grid=(m // tm,),
            in_specs=[pl.BlockSpec((tm, c), lambda i: (i, 0)),
                      pl.BlockSpec((c, nout), lambda i: (0, 0)),
                      pl.BlockSpec((1, nout), lambda i: (0, 0))],
            out_specs=pl.BlockSpec((tm, nout), lambda i: (i, 0))),
        compiler_params=pltpu.CompilerParams(dimension_semantics=("parallel",)),
    )(x_rows, w, b)


def _pair_fuse(querys, keys, x_rows, favg0, sw_t, sb_row,
               tgt, src, outb, first, n_batch):
    """One pallas_call over all CAV pairs (scalar-prefetched offsets)."""
    n_pairs, = tgt.shape
    _, hw, kd = querys.shape
    c = x_rows.shape[-1]
    s_in, s_pad = sw_t.shape
    grid_spec = pltpu.PrefetchScalarGridSpec(
        num_scalar_prefetch=4,
        grid=(n_pairs,),
        in_specs=[
            pl.BlockSpec((1, hw, kd), lambda p, t, s, ob, fr: (t[p], 0, 0)),   # query[ego]
            pl.BlockSpec((1, hw, kd), lambda p, t, s, ob, fr: (s[p], 0, 0)),   # key[i]
            pl.BlockSpec((1, hw, c),  lambda p, t, s, ob, fr: (t[p], 0, 0)),   # ego feature
            pl.BlockSpec((1, 1, c),   lambda p, t, s, ob, fr: (s[p], 0, 0)),   # favg row 0
            # TODO(synk): pipeline_mode=pl.Buffered(1) for the two grid-invariant
            # smoothing blocks once single-buffered BlockSpecs are supported.
            pl.BlockSpec((s_in, s_pad), lambda p, t, s, ob, fr: (0, 0)),       # smoothing W^T
            pl.BlockSpec((1, s_pad),    lambda p, t, s, ob, fr: (0, 0)),       # smoothing b
        ],
        out_specs=[
            pl.BlockSpec((1, hw, s_pad), lambda p, t, s, ob, fr: (p, 0, 0)),
            pl.BlockSpec((1, hw, c),     lambda p, t, s, ob, fr: (ob[p], 0, 0)),  # revisited
        ],
    )
    return pl.pallas_call(
        functools.partial(_pair_fuse_kernel, hw=hw, s_in=s_in, s_pad=s_pad),
        out_shape=(jax.ShapeDtypeStruct((n_pairs, hw, s_pad), jnp.float32),
                   jax.ShapeDtypeStruct((n_batch, hw, c), jnp.float32)),
        grid_spec=grid_spec,
        compiler_params=pltpu.CompilerParams(
            # "arbitrary": the fused output block is revisited / accumulated
            # across consecutive pairs of the same batch.
            dimension_semantics=("arbitrary",),
            vmem_limit_bytes=_pair_vmem_limit(),
        ),
    )(tgt, src, outb, first, querys, keys, x_rows, favg0, sw_t, sb_row)


# ------------------------------ forward pass ---------------------------------

def point_pillar_mash_forward(spatial_features_2d, record_len, params):
    record_len = tuple(int(r) for r in record_len)
    n, c, h, w = spatial_features_2d.shape
    hw = h * w
    b_total = len(record_len)
    offsets = np.concatenate([[0], np.cumsum(np.asarray(record_len))]).astype(np.int32)

    # ---- one-time NCHW -> channels-last rows (lane-dense layout everywhere) ----
    x_cl = jnp.transpose(spatial_features_2d, (0, 2, 3, 1))            # [N, H, W, C]
    x_rows = x_cl.reshape(n, hw, c)

    # The reference's grid_sample is only ever kept at grid point (-1,-1)
    # (see _pair_fuse_kernel), whose bilinear zero-padded sample is
    # 0.25 * feature[:, 0, 0]; that single row is all we need per agent.
    favg0 = 0.25 * x_cl[:, 0:1, 0, :]                                  # [N, 1, C]

    # ---- parameter prep (tiny, traced once) ----
    # TODO(synk): QueryEncoder / KeyEncoder internals not given; linear 1x1-conv
    # stand-ins let queryKeySim be folded algebraically into the query weights.
    wq = jnp.dot(params["qksim_w"], params["query_enc_w"])             # [Kd, C]
    bq = jnp.dot(params["qksim_w"], params["query_enc_b"]) + params["qksim_b"]
    wk, bk = params["key_enc_w"], params["key_enc_b"]
    kd = wk.shape[0]
    w_qk = jnp.concatenate([wq.T, wk.T], axis=1)                       # [C, 2Kd]
    b_qk = jnp.concatenate([bq, bk]).reshape(1, 2 * kd)

    s_real = hw + 1
    s_in = -(-s_real // 16) * 16                                       # bf16 K pad
    s_pad = -(-s_real // 128) * 128                                    # lane-dense out pad
    sw_t = jnp.zeros((s_in, s_pad), jnp.float32).at[:s_real, :s_real].set(
        params["smooth_w"].T).astype(jnp.bfloat16)
    sb_row = jnp.full((1, s_pad), _NEG, jnp.float32).at[0, :s_real].set(
        params["smooth_b"])

    w_heads = jnp.concatenate([params["cls_w"], params["reg_w"]], axis=0).T  # [C, 8a]
    b_heads = jnp.concatenate([params["cls_b"], params["reg_b"]])
    n_cls = params["cls_w"].shape[0]
    n_out = w_heads.shape[1]
    n_out_pad = -(-n_out // 128) * 128
    w_heads_pad = jnp.zeros((c, n_out_pad), jnp.float32).at[:, :n_out].set(w_heads)
    b_heads_pad = jnp.zeros((1, n_out_pad), jnp.float32).at[0, :n_out].set(b_heads)

    # ---- query/key encoders: ONE fused, M-tiled, parallel-grid matmul pass ----
    qk = _encode(x_rows.reshape(n * hw, c), w_qk, b_qk).reshape(n, hw, 2 * kd)
    querys = qk[..., :kd]                                              # bf16
    keys = qk[..., kd:]                                                # bf16

    # ---- static pair bookkeeping from record_len ----
    tgt, src, outb, first = [], [], [], []
    for b in range(b_total):
        for i in range(1, record_len[b]):
            tgt.append(int(offsets[b]))
            src.append(int(offsets[b]) + i)
            outb.append(b)
            first.append(1 if i == 1 else 0)
    n_pairs = len(tgt)

    ego_rows = x_rows[np.asarray(offsets[:b_total])]                   # [B, HW, C]
    if n_pairs:
        corr_dec, fused_rows = _pair_fuse(
            querys, keys, x_rows, favg0, sw_t, sb_row,
            jnp.asarray(tgt, jnp.int32), jnp.asarray(src, jnp.int32),
            jnp.asarray(outb, jnp.int32), jnp.asarray(first, jnp.int32),
            b_total)
        # kernel writes [pair, HW_tgt, S_pad]; single wrapper-side transpose
        # restores the module's [pair, HW_src+1, H, W] orientation.
        corr_vol = jnp.transpose(corr_dec[:, :, :s_real], (0, 2, 1)).reshape(
            n_pairs, s_real, h, w)
        # batches containing only the ego agent never visit the fused output
        visited = jnp.asarray([rl > 1 for rl in record_len], jnp.bool_)
        fused_rows = jnp.where(visited[:, None, None], fused_rows, ego_rows)
    else:
        corr_vol = None
        fused_rows = ego_rows

    # ---- detection heads (cls + reg merged, lane-padded output) ----
    heads = _heads(fused_rows.reshape(b_total * hw, c), w_heads_pad, b_heads_pad)
    heads = heads.reshape(b_total, h, w, n_out_pad)
    psm = jnp.transpose(heads[..., :n_cls], (0, 3, 1, 2))
    rm = jnp.transpose(heads[..., n_cls:n_out], (0, 3, 1, 2))
    return {"cls_preds": psm, "reg_preds": rm, "corr_vol": corr_vol}


# ------------------------------ params & reference ---------------------------

def init_params(key, feature_dim, query_dim, key_dim, hw, anchor_number):
    def conv(k, cout, cin):
        kw, kb = jax.random.split(k)
        s = 1.0 / np.sqrt(cin)
        return (jax.random.uniform(kw, (cout, cin), jnp.float32, -s, s),
                jax.random.uniform(kb, (cout,), jnp.float32, -s, s))

    ks = jax.random.split(key, 6)
    p = {}
    p["query_enc_w"], p["query_enc_b"] = conv(ks[0], query_dim, feature_dim)
    p["key_enc_w"], p["key_enc_b"] = conv(ks[1], key_dim, feature_dim)
    p["qksim_w"], p["qksim_b"] = conv(ks[2], key_dim, query_dim)        # queryKeySim
    p["smooth_w"], p["smooth_b"] = conv(ks[3], hw + 1, hw + 1)          # smoothing stand-in
    p["cls_w"], p["cls_b"] = conv(ks[4], anchor_number, feature_dim)
    p["reg_w"], p["reg_b"] = conv(ks[5], 7 * anchor_number, feature_dim)
    return p


def _reference_corr_vol(x, record_len, params):
    """Pure-JAX mirror of computeCorrespondenceVolume + smoothing stand-in
    (same bf16 precision choices as the kernel)."""
    n, c, h, w = x.shape
    hw = h * w
    record_len = tuple(int(r) for r in record_len)
    offsets = np.concatenate([[0], np.cumsum(np.asarray(record_len))]).astype(int)
    x_rows = jnp.transpose(x, (0, 2, 3, 1)).reshape(n, hw, c)
    wq = jnp.dot(params["qksim_w"], params["query_enc_w"])
    bq = jnp.dot(params["qksim_w"], params["query_enc_b"]) + params["qksim_b"]
    querys = (jnp.einsum("npc,kc->npk", x_rows, wq) + bq).astype(jnp.bfloat16)
    keys = (jnp.einsum("npc,kc->npk", x_rows, params["key_enc_w"])
            + params["key_enc_b"]).astype(jnp.bfloat16)
    sw_t = params["smooth_w"].T.astype(jnp.bfloat16)
    vols = []
    for b in range(len(record_len)):
        for i in range(1, record_len[b]):
            fa = querys[offsets[b]]
            fb = keys[offsets[b] + i]
            fa32 = fa.astype(jnp.float32)
            fb32 = fb.astype(jnp.float32)
            g = jnp.dot(fa, fb.T, preferred_element_type=jnp.float32)
            fa2 = jnp.sum(fa32 * fa32, axis=-1, keepdims=True)
            fb2 = jnp.sum(fb32 * fb32, axis=-1, keepdims=True)
            dist = jnp.sqrt(jnp.maximum(fa2 + fb2.T - 2.0 * g, 0.0))
            corr = jnp.concatenate([-dist, -jnp.sqrt(fa2)], axis=-1)
            dec = (jnp.dot(corr.astype(jnp.bfloat16), sw_t,
                           preferred_element_type=jnp.float32)
                   + params["smooth_b"][None, :])
            vols.append(dec.T.reshape(hw + 1, h, w))
    return jnp.stack(vols) if vols else None


def _reference_heads(x, record_len, params, corr_vol):
    """Pure-JAX idx2grid + grid_sample + fusion + heads (general gather path,
    reusing the kernel's corr_vol so argmax ties match exactly)."""
    n, c, h, w = x.shape
    hw = h * w
    record_len = tuple(int(r) for r in record_len)
    offsets = np.concatenate([[0], np.cumsum(np.asarray(record_len))]).astype(int)
    x_cl = jnp.transpose(x, (0, 2, 3, 1))
    x_rows = x_cl.reshape(n, hw, c)
    xp = jnp.pad(x_cl, ((0, 0), (1, 0), (1, 0), (0, 0)))
    favg = (0.25 * (xp[:, :h, :w] + xp[:, :h, 1:] + xp[:, 1:, :w]
                    + xp[:, 1:, 1:])).reshape(n, hw, c)
    fused, p = [], 0
    for b in range(len(record_len)):
        acc = x_rows[offsets[b]]
        for i in range(1, record_len[b]):
            dec = corr_vol[p].reshape(hw + 1, hw)
            p += 1
            weight = jnp.max(dec, axis=0)
            idx = jnp.argmax(dec, axis=0)
            mask = idx == hw
            srcp = jnp.where(mask, 0, idx)
            warp = favg[offsets[b] + i][srcp] * (weight * mask)[:, None]
            acc = jnp.maximum(acc, warp)
        fused.append(acc)
    fused = jnp.stack(fused)
    psm = jnp.einsum("bpc,ac->bpa", fused, params["cls_w"]) + params["cls_b"]
    rm = jnp.einsum("bpc,ac->bpa", fused, params["reg_w"]) + params["reg_b"]
    n_b = len(record_len)
    psm = jnp.transpose(psm.reshape(n_b, h, w, -1), (0, 3, 1, 2))
    rm = jnp.transpose(rm.reshape(n_b, h, w, -1), (0, 3, 1, 2))
    return psm, rm


if __name__ == "__main__":
    key = jax.random.PRNGKey(0)
    kx, kp = jax.random.split(key)

    feature_dim = 256            # 128 * 2 as required by cls_head / reg_head
    query_dim, key_dim = 32, 32
    H = W = 8                    # mash H, W
    anchor_number = 2
    record_len = (3, 2, 1)       # B = 3 samples: ego+2, ego+1, ego-only (3 pairs)
    n_total = int(sum(record_len))
    B = len(record_len)

    params = init_params(kp, feature_dim, query_dim, key_dim, H * W, anchor_number)
    spatial_features_2d = jax.random.normal(kx, (n_total, feature_dim, H, W),
                                            dtype=jnp.float32)

    fwd = jax.jit(point_pillar_mash_forward, static_argnames="record_len")
    out = jax.block_until_ready(fwd(spatial_features_2d,
                                    record_len=record_len, params=params))

    assert out["cls_preds"].shape == (B, anchor_number, H, W)
    assert out["reg_preds"].shape == (B, 7 * anchor_number, H, W)
    assert out["corr_vol"].shape == (3, H * W + 1, H, W)

    # light numerical self-checks against a pure-JAX reference
    ref_vol = _reference_corr_vol(spatial_features_2d, record_len, params)
    np.testing.assert_allclose(np.asarray(out["corr_vol"]), np.asarray(ref_vol),
                               rtol=0.1, atol=0.1)
    ref_psm, ref_rm = _reference_heads(spatial_features_2d, record_len, params,
                                       out["corr_vol"])
    np.testing.assert_allclose(np.asarray(out["cls_preds"]), np.asarray(ref_psm),
                               rtol=1e-2, atol=1e-2)
    np.testing.assert_allclose(np.asarray(out["reg_preds"]), np.asarray(ref_rm),
                               rtol=1e-2, atol=1e-2)
    print("KERNEL_OK")
</pallas_src>

<mosaic_0001>
module attributes {stable_mosaic.version = 11 : i64} {
  func.func @_encoder_kernel(%arg0: i32, %arg1: memref<192x256xf32, #tpu.memory_space<vmem>>, %arg2: memref<256x64xf32, #tpu.memory_space<vmem>>, %arg3: memref<1x64xf32, #tpu.memory_space<vmem>>, %arg4: memref<192x64xbf16, #tpu.memory_space<vmem>>) attributes {dimension_semantics = [#tpu.dimension_semantics<parallel>], iteration_bounds = array<i64: 2>, scalar_prefetch = 0 : i64, scratch_operands = 0 : i64, tpu.core_type = #tpu.core_type<tc>, window_params = [{transform_indices = @transform_0, window_bounds = array<i64: 192, 256>}, {pipeline_mode = #tpu.pipeline_mode<synchronous>, transform_indices = @transform_1, window_bounds = array<i64: 256, 64>}, {pipeline_mode = #tpu.pipeline_mode<synchronous>, transform_indices = @transform_2, window_bounds = array<i64: 1, 64>}, {transform_indices = @transform_3, window_bounds = array<i64: 192, 64>}]} {
    %c0 = arith.constant 0 : index
    %c0_0 = arith.constant 0 : index
    %0 = vector.load %arg1[%c0, %c0_0] : memref<192x256xf32, #tpu.memory_space<vmem>>, vector<192x256xf32>
    %c0_1 = arith.constant 0 : index
    %c0_2 = arith.constant 0 : index
    %1 = vector.load %arg2[%c0_1, %c0_2] : memref<256x64xf32, #tpu.memory_space<vmem>>, vector<256x64xf32>
    %cst = arith.constant dense<0.000000e+00> : vector<192x64xf32>
    %2 = tpu.matmul %0, %1, %cst {dimension_numbers = #tpu.dot_dimension_numbers<[1], [0], [0], [1], [0, 0, 1, 1], [], []>} : vector<192x256xf32>, vector<256x64xf32>, vector<192x64xf32> -> vector<192x64xf32>
    %c0_3 = arith.constant 0 : index
    %c0_4 = arith.constant 0 : index
    %3 = vector.load %arg3[%c0_3, %c0_4] : memref<1x64xf32, #tpu.memory_space<vmem>>, vector<1x64xf32>
    %4 = vector.broadcast %3 : vector<1x64xf32> to vector<192x64xf32>
    %5 = arith.addf %2, %4 : vector<192x64xf32>
    %6 = arith.truncf %5 : vector<192x64xf32> to vector<192x64xbf16>
    %c0_5 = arith.constant 0 : index
    %c0_6 = arith.constant 0 : index
    %7 = vector.load %arg4[%c0_5, %c0_6] : memref<192x64xbf16, #tpu.memory_space<vmem>>, vector<192x64xbf16>
    tpu.vector_store %arg4[%c0_5, %c0_6], %6 {strides = array<i32>} : memref<192x64xbf16, #tpu.memory_space<vmem>>, vector<192x64xbf16>,
    return
  }
  func.func @transform_0(%arg0: i32) -> (i32, i32) {
    %c0_i32 = arith.constant 0 : i32
    %c0_i32_0 = arith.constant 0 : i32
    return %arg0, %c0_i32 : i32, i32
  }
  func.func @transform_1(%arg0: i32) -> (i32, i32) {
    %c0_i32 = arith.constant 0 : i32
    %c0_i32_0 = arith.constant 0 : i32
    %c0_i32_1 = arith.constant 0 : i32
    return %c0_i32, %c0_i32_0 : i32, i32
  }
  func.func @transform_2(%arg0: i32) -> (i32, i32) {
    %c0_i32 = arith.constant 0 : i32
    %c0_i32_0 = arith.constant 0 : i32
    %c0_i32_1 = arith.constant 0 : i32
    return %c0_i32, %c0_i32_0 : i32, i32
  }
  func.func @transform_3(%arg0: i32) -> (i32, i32) {
    %c0_i32 = arith.constant 0 : i32
    %c0_i32_0 = arith.constant 0 : i32
    return %arg0, %c0_i32 : i32, i32
  }
}

module attributes {stable_mosaic.version = 11 : i64} {
  func.func @_pair_fuse_kernel(%arg0: i32, %arg1: memref<3xi32, #tpu.memory_space<smem>>, %arg2: memref<3xi32, #tpu.memory_space<smem>>, %arg3: memref<3xi32, #tpu.memory_space<smem>>, %arg4: memref<3xi32, #tpu.memory_space<smem>>, %arg5: memref<1x64x32xbf16, #tpu.memory_space<vmem>>, %arg6: memref<1x64x32xbf16, #tpu.memory_space<vmem>>, %arg7: memref<1x64x256xf32, #tpu.memory_space<vmem>>, %arg8: memref<1x1x256xf32, #tpu.memory_space<vmem>>, %arg9: memref<80x128xbf16, #tpu.memory_space<vmem>>, %arg10: memref<1x128xf32, #tpu.memory_space<vmem>>, %arg11: memref<1x64x128xf32, #tpu.memory_space<vmem>>, %arg12: memref<1x64x256xf32, #tpu.memory_space<vmem>>) attributes {dimension_semantics = [#tpu.dimension_semantics<arbitrary>], iteration_bounds = array<i64: 3>, scalar_prefetch = 4 : i64, scratch_operands = 0 : i64, tpu.core_type = #tpu.core_type<tc>, window_params = [{transform_indices = @transform_0, window_bounds = array<i64: 1, 64, 32>}, {transform_indices = @transform_1, window_bounds = array<i64: 1, 64, 32>}, {transform_indices = @transform_2, window_bounds = array<i64: 1, 64, 256>}, {transform_indices = @transform_3, window_bounds = array<i64: 1, 1, 256>}, {pipeline_mode = #tpu.pipeline_mode<synchronous>, transform_indices = @transform_4, window_bounds = array<i64: 80, 128>}, {pipeline_mode = #tpu.pipeline_mode<synchronous>, transform_indices = @transform_5, window_bounds = array<i64: 1, 128>}, {transform_indices = @transform_6, window_bounds = array<i64: 1, 64, 128>}, {transform_indices = @transform_7, window_bounds = array<i64: 1, 64, 256>}]} {
    %c0 = arith.constant 0 : index
    %c0_0 = arith.constant 0 : index
    %c0_1 = arith.constant 0 : index
    %0 = vector.load %arg5[%c0, %c0_0, %c0_1] : memref<1x64x32xbf16, #tpu.memory_space<vmem>>, vector<1x64x32xbf16>
    %1 = vector.shape_cast %0 : vector<1x64x32xbf16> to vector<64x32xbf16>
    %c0_2 = arith.constant 0 : index
    %c0_3 = arith.constant 0 : index
    %c0_4 = arith.constant 0 : index
    %2 = vector.load %arg6[%c0_2, %c0_3, %c0_4] : memref<1x64x32xbf16, #tpu.memory_space<vmem>>, vector<1x64x32xbf16>
    %3 = vector.shape_cast %2 : vector<1x64x32xbf16> to vector<64x32xbf16>
    %4 = arith.extf %1 : vector<64x32xbf16> to vector<64x32xf32>
    %5 = arith.extf %3 : vector<64x32xbf16> to vector<64x32xf32>
    "tpu.trace_start"() <{level = 10 : i32, message = "td,sd->ts"}> : () -> ()
    %cst = arith.constant dense<0.000000e+00> : vector<64x64xf32>
    %6 = tpu.matmul %1, %3, %cst {dimension_numbers = #tpu.dot_dimension_numbers<[1], [1], [0], [0], [0, 0, 1, 0], [], []>} : vector<64x32xbf16>, vector<64x32xbf16>, vector<64x64xf32> -> vector<64x64xf32>
    "tpu.trace_stop"() : () -> ()
    %7 = arith.mulf %4, %4 : vector<64x32xf32>
    %cst_5 = arith.constant dense<0.000000e+00> : vector<64xf32>
    %8 = vector.multi_reduction <add>, %7, %cst_5 [1] : vector<64x32xf32> to vector<64xf32>
    %9 = vector.shape_cast %8 : vector<64xf32> to vector<64x1xf32>
    %10 = arith.mulf %5, %5 : vector<64x32xf32>
    %cst_6 = arith.constant dense<0.000000e+00> : vector<64xf32>
    %11 = vector.multi_reduction <add>, %10, %cst_6 [1] : vector<64x32xf32> to vector<64xf32>
    %12 = vector.shape_cast %11 : vector<64xf32> to vector<64x1xf32>
    %13 = tpu.transpose %12, [1, 0] : vector<64x1xf32> -> vector<1x64xf32>
    %14 = vector.broadcast %9 : vector<64x1xf32> to vector<64x64xf32>
    %15 = vector.broadcast %13 : vector<1x64xf32> to vector<64x64xf32>
    %16 = arith.addf %14, %15 : vector<64x64xf32>
    %cst_7 = arith.constant 2.000000e+00 : f32
    %17 = vector.broadcast %cst_7 : f32 to vector<64x64xf32>
    %18 = arith.mulf %17, %6 : vector<64x64xf32>
    %19 = arith.subf %16, %18 : vector<64x64xf32>
    %cst_8 = arith.constant 0.000000e+00 : f32
    %20 = vector.broadcast %cst_8 : f32 to vector<64x64xf32>
    %21 = arith.maximumf %19, %20 : vector<64x64xf32>
    %22 = math.sqrt %21 : vector<64x64xf32>
    %cst_9 = arith.constant 0.000000e+00 : f32
    %23 = vector.broadcast %cst_9 : f32 to vector<64x64xf32>
    %24 = arith.subf %23, %22 : vector<64x64xf32>
    %25 = math.sqrt %9 : vector<64x1xf32>
    %cst_10 = arith.constant 0.000000e+00 : f32
    %26 = vector.broadcast %cst_10 : f32 to vector<64x1xf32>
    %27 = arith.subf %26, %25 : vector<64x1xf32>
    %cst_11 = arith.constant 0.000000e+00 : f32
    %28 = vector.broadcast %cst_11 : f32 to vector<64x15xf32>
    %29 = tpu.concatenate %24, %27, %28 in 1 : vector<64x64xf32>, vector<64x1xf32>, vector<64x15xf32> -> vector<64x80xf32>
    %30 = arith.truncf %29 : vector<64x80xf32> to vector<64x80xbf16>
    %c0_12 = arith.constant 0 : index
    %c0_13 = arith.constant 0 : index
    %31 = vector.load %arg9[%c0_12, %c0_13] : memref<80x128xbf16, #tpu.memory_space<vmem>>, vector<80x128xbf16>
    %cst_14 = arith.constant dense<0.000000e+00> : vector<64x128xf32>
    %32 = tpu.matmul %30, %31, %cst_14 {dimension_numbers = #tpu.dot_dimension_numbers<[1], [0], [0], [1], [0, 0, 1, 1], [], []>} : vector<64x80xbf16>, vector<80x128xbf16>, vector<64x128xf32> -> vector<64x128xf32>
    %c0_15 = arith.constant 0 : index
    %c0_16 = arith.constant 0 : index
    %33 = vector.load %arg10[%c0_15, %c0_16] : memref<1x128xf32, #tpu.memory_space<vmem>>, vector<1x128xf32>
    %34 = vector.broadcast %33 : vector<1x128xf32> to vector<64x128xf32>
    %35 = arith.addf %32, %34 : vector<64x128xf32>
    %c0_17 = arith.constant 0 : index
    %c0_18 = arith.constant 0 : index
    %c0_19 = arith.constant 0 : index
    %36 = vector.load %arg11[%c0_17, %c0_18, %c0_19] : memref<1x64x128xf32, #tpu.memory_space<vmem>>, vector<1x64x128xf32>
    %37 = vector.shape_cast %36 : vector<1x64x128xf32> to vector<64x128xf32>
    %38 = vector.shape_cast %35 : vector<64x128xf32> to vector<1x64x128xf32>
    tpu.vector_store %arg11[%c0_17, %c0_18, %c0_19], %38 {strides = array<i32>} : memref<1x64x128xf32, #tpu.memory_space<vmem>>, vector<1x64x128xf32>,
    %cst_20 = arith.constant dense<0xFF800000> : vector<64xf32>
    %39 = vector.multi_reduction <maximumf>, %35, %cst_20 [1] : vector<64x128xf32> to vector<64xf32>
    %40 = vector.shape_cast %39 : vector<64xf32> to vector<64x1xf32>
    %41 = tpu.iota {dimensions = array<i32: 1>} : vector<64x128xi32>
    %42 = vector.broadcast %40 : vector<64x1xf32> to vector<64x128xf32>
    %43 = arith.cmpf oeq, %35, %42 : vector<64x128xf32>
    %c128_i32 = arith.constant 128 : i32
    %44 = vector.broadcast %c128_i32 : i32 to vector<64x128xi32>
    %45 = arith.select %43, %41, %44 : vector<64x128xi1>, vector<64x128xi32>
    %cst_21 = arith.constant dense<2147483647> : vector<64xi32>
    %46 = vector.multi_reduction <minsi>, %45, %cst_21 [1] : vector<64x128xi32> to vector<64xi32>
    %47 = vector.shape_cast %46 : vector<64xi32> to vector<64x1xi32>
    %c64_i32 = arith.constant 64 : i32
    %48 = vector.broadcast %c64_i32 : i32 to vector<64x1xi32>
    %49 = arith.cmpi eq, %47, %48 : vector<64x1xi32>
    %50 = arith.extui %49 : vector<64x1xi1> to vector<64x1xi32>
    %51 = arith.sitofp %50 : vector<64x1xi32> to vector<64x1xf32>
    %52 = arith.mulf %40, %51 : vector<64x1xf32>
    %c0_22 = arith.constant 0 : index
    %c0_23 = arith.constant 0 : index
    %c0_24 = arith.constant 0 : index
    %53 = vector.load %arg8[%c0_22, %c0_23, %c0_24] : memref<1x1x256xf32, #tpu.memory_space<vmem>>, vector<1x1x256xf32>
    %54 = vector.shape_cast %53 : vector<1x1x256xf32> to vector<1x256xf32>
    %55 = vector.broadcast %52 : vector<64x1xf32> to vector<64x256xf32>
    %56 = vector.broadcast %54 : vector<1x256xf32> to vector<64x256xf32>
    %57 = arith.mulf %55, %56 : vector<64x256xf32>
    %58 = arith.index_cast %arg0 : i32 to index
    %59 = memref.load %arg4[%58] : memref<3xi32, #tpu.memory_space<smem>>
    %c1_i32 = arith.constant 1 : i32
    %60 = arith.cmpi eq, %59, %c1_i32 : i32
    %61 = arith.extui %60 : i1 to i32
    %c0_i32 = arith.constant 0 : i32
    %62 = arith.cmpi ne, %61, %c0_i32 : i32
    scf.if %62 {
      %c0_27 = arith.constant 0 : index
      %c0_28 = arith.constant 0 : index
      %c0_29 = arith.constant 0 : index
      %68 = vector.load %arg7[%c0_27, %c0_28, %c0_29] : memref<1x64x256xf32, #tpu.memory_space<vmem>>, vector<1x64x256xf32>
      %69 = vector.shape_cast %68 : vector<1x64x256xf32> to vector<64x256xf32>
      %70 = arith.maximumf %69, %57 : vector<64x256xf32>
      %c0_30 = arith.constant 0 : index
      %c0_31 = arith.constant 0 : index
      %c0_32 = arith.constant 0 : index
      %71 = vector.load %arg12[%c0_30, %c0_31, %c0_32] : memref<1x64x256xf32, #tpu.memory_space<vmem>>, vector<1x64x256xf32>
      %72 = vector.shape_cast %71 : vector<1x64x256xf32> to vector<64x256xf32>
      %73 = vector.shape_cast %70 : vector<64x256xf32> to vector<1x64x256xf32>
      tpu.vector_store %arg12[%c0_30, %c0_31, %c0_32], %73 {strides = array<i32>} : memref<1x64x256xf32, #tpu.memory_space<vmem>>, vector<1x64x256xf32>,
    } else {
    }
    %63 = arith.index_cast %arg0 : i32 to index
    %64 = memref.load %arg4[%63] : memref<3xi32, #tpu.memory_space<smem>>
    %c0_i32_25 = arith.constant 0 : i32
    %65 = arith.cmpi eq, %64, %c0_i32_25 : i32
    %66 = arith.extui %65 : i1 to i32
    %c0_i32_26 = arith.constant 0 : i32
    %67 = arith.cmpi ne, %66, %c0_i32_26 : i32
    scf.if %67 {
      %c0_27 = arith.constant 0 : index
      %c0_28 = arith.constant 0 : index
      %c0_29 = arith.constant 0 : index
      %68 = vector.load %arg12[%c0_27, %c0_28, %c0_29] : memref<1x64x256xf32, #tpu.memory_space<vmem>>, vector<1x64x256xf32>
      %69 = vector.shape_cast %68 : vector<1x64x256xf32> to vector<64x256xf32>
      %70 = arith.maximumf %69, %57 : vector<64x256xf32>
      %c0_30 = arith.constant 0 : index
      %c0_31 = arith.constant 0 : index
      %c0_32 = arith.constant 0 : index
      %71 = vector.load %arg12[%c0_30, %c0_31, %c0_32] : memref<1x64x256xf32, #tpu.memory_space<vmem>>, vector<1x64x256xf32>
      %72 = vector.shape_cast %71 : vector<1x64x256xf32> to vector<64x256xf32>
      %73 = vector.shape_cast %70 : vector<64x256xf32> to vector<1x64x256xf32>
      tpu.vector_store %arg12[%c0_30, %c0_31, %c0_32], %73 {strides = array<i32>} : memref<1x64x256xf32, #tpu.memory_space<vmem>>, vector<1x64x256xf32>,
    } else {
    }
    return
  }
  func.func @transform_0(%arg0: i32, %arg1: memref<3xi32, #tpu.memory_space<smem>>, %arg2: memref<3xi32, #tpu.memory_space<smem>>, %arg3: memref<3xi32, #tpu.memory_space<smem>>, %arg4: memref<3xi32, #tpu.memory_space<smem>>) -> (i32, i32, i32) {
    %0 = arith.index_cast %arg0 : i32 to index
    %1 = memref.load %arg1[%0] : memref<3xi32, #tpu.memory_space<smem>>
    %c0_i32 = arith.constant 0 : i32
    %c0_i32_0 = arith.constant 0 : i32
    %c0_i32_1 = arith.constant 0 : i32
    return %1, %c0_i32, %c0_i32_0 : i32, i32, i32
  }
  func.func @transform_1(%arg0: i32, %arg1: memref<3xi32, #tpu.memory_space<smem>>, %arg2: memref<3xi32, #tpu.memory_space<smem>>, %arg3: memref<3xi32, #tpu.memory_space<smem>>, %arg4: memref<3xi32, #tpu.memory_space<smem>>) -> (i32, i32, i32) {
    %0 = arith.index_cast %arg0 : i32 to index
    %1 = memref.load %arg2[%0] : memref<3xi32, #tpu.memory_space<smem>>
    %c0_i32 = arith.constant 0 : i32
    %c0_i32_0 = arith.constant 0 : i32
    %c0_i32_1 = arith.constant 0 : i32
    return %1, %c0_i32, %c0_i32_0 : i32, i32, i32
  }
  func.func @transform_2(%arg0: i32, %arg1: memref<3xi32, #tpu.memory_space<smem>>, %arg2: memref<3xi32, #tpu.memory_space<smem>>, %arg3: memref<3xi32, #tpu.memory_space<smem>>, %arg4: memref<3xi32, #tpu.memory_space<smem>>) -> (i32, i32, i32) {
    %0 = arith.index_cast %arg0 : i32 to index
    %1 = memref.load %arg1[%0] : memref<3xi32, #tpu.memory_space<smem>>
    %c0_i32 = arith.constant 0 : i32
    %c0_i32_0 = arith.constant 0 : i32
    %c0_i32_1 = arith.constant 0 : i32
    return %1, %c0_i32, %c0_i32_0 : i32, i32, i32
  }
  func.func @transform_3(%arg0: i32, %arg1: memref<3xi32, #tpu.memory_space<smem>>, %arg2: memref<3xi32, #tpu.memory_space<smem>>, %arg3: memref<3xi32, #tpu.memory_space<smem>>, %arg4: memref<3xi32, #tpu.memory_space<smem>>) -> (i32, i32, i32) {
    %0 = arith.index_cast %arg0 : i32 to index
    %1 = memref.load %arg2[%0] : memref<3xi32, #tpu.memory_space<smem>>
    %c0_i32 = arith.constant 0 : i32
    %c0_i32_0 = arith.constant 0 : i32
    %c0_i32_1 = arith.constant 0 : i32
    return %1, %c0_i32, %c0_i32_0 : i32, i32, i32
  }
  func.func @transform_4(%arg0: i32, %arg1: memref<3xi32, #tpu.memory_space<smem>>, %arg2: memref<3xi32, #tpu.memory_space<smem>>, %arg3: memref<3xi32, #tpu.memory_space<smem>>, %arg4: memref<3xi32, #tpu.memory_space<smem>>) -> (i32, i32) {
    %c0_i32 = arith.constant 0 : i32
    %c0_i32_0 = arith.constant 0 : i32
    %c0_i32_1 = arith.constant 0 : i32
    return %c0_i32, %c0_i32_0 : i32, i32
  }
  func.func @transform_5(%arg0: i32, %arg1: memref<3xi32, #tpu.memory_space<smem>>, %arg2: memref<3xi32, #tpu.memory_space<smem>>, %arg3: memref<3xi32, #tpu.memory_space<smem>>, %arg4: memref<3xi32, #tpu.memory_space<smem>>) -> (i32, i32) {
    %c0_i32 = arith.constant 0 : i32
    %c0_i32_0 = arith.constant 0 : i32
    %c0_i32_1 = arith.constant 0 : i32
    return %c0_i32, %c0_i32_0 : i32, i32
  }
  func.func @transform_6(%arg0: i32, %arg1: memref<3xi32, #tpu.memory_space<smem>>, %arg2: memref<3xi32, #tpu.memory_space<smem>>, %arg3: memref<3xi32, #tpu.memory_space<smem>>, %arg4: memref<3xi32, #tpu.memory_space<smem>>) -> (i32, i32, i32) {
    %c0_i32 = arith.constant 0 : i32
    %c0_i32_0 = arith.constant 0 : i32
    %c0_i32_1 = arith.constant 0 : i32
    return %arg0, %c0_i32, %c0_i32_0 : i32, i32, i32
  }
  func.func @transform_7(%arg0: i32, %arg1: memref<3xi32, #tpu.memory_space<smem>>, %arg2: memref<3xi32, #tpu.memory_space<smem>>, %arg3: memref<3xi32, #tpu.memory_space<smem>>, %arg4: memref<3xi32, #tpu.memory_space<smem>>) -> (i32, i32, i32) {
    %0 = arith.index_cast %arg0 : i32 to index
    %1 = memref.load %arg3[%0] : memref<3xi32, #tpu.memory_space<smem>>
    %c0_i32 = arith.constant 0 : i32
    %c0_i32_0 = arith.constant 0 : i32
    %c0_i32_1 = arith.constant 0 : i32
    return %1, %c0_i32, %c0_i32_0 : i32, i32, i32
  }
}

module attributes {stable_mosaic.version = 11 : i64} {
  func.func @_heads_kernel(%arg0: i32, %arg1: memref<96x256xf32, #tpu.memory_space<vmem>>, %arg2: memref<256x128xf32, #tpu.memory_space<vmem>>, %arg3: memref<1x128xf32, #tpu.memory_space<vmem>>, %arg4: memref<96x128xf32, #tpu.memory_space<vmem>>) attributes {dimension_semantics = [#tpu.dimension_semantics<parallel>], iteration_bounds = array<i64: 2>, scalar_prefetch = 0 : i64, scratch_operands = 0 : i64, tpu.core_type = #tpu.core_type<tc>, window_params = [{transform_indices = @transform_0, window_bounds = array<i64: 96, 256>}, {pipeline_mode = #tpu.pipeline_mode<synchronous>, transform_indices = @transform_1, window_bounds = array<i64: 256, 128>}, {pipeline_mode = #tpu.pipeline_mode<synchronous>, transform_indices = @transform_2, window_bounds = array<i64: 1, 128>}, {transform_indices = @transform_3, window_bounds = array<i64: 96, 128>}]} {
    %c0 = arith.constant 0 : index
    %c0_0 = arith.constant 0 : index
    %0 = vector.load %arg1[%c0, %c0_0] : memref<96x256xf32, #tpu.memory_space<vmem>>, vector<96x256xf32>
    %c0_1 = arith.constant 0 : index
    %c0_2 = arith.constant 0 : index
    %1 = vector.load %arg2[%c0_1, %c0_2] : memref<256x128xf32, #tpu.memory_space<vmem>>, vector<256x128xf32>
    %cst = arith.constant dense<0.000000e+00> : vector<96x128xf32>
    %2 = tpu.matmul %0, %1, %cst {dimension_numbers = #tpu.dot_dimension_numbers<[1], [0], [0], [1], [0, 0, 1, 1], [], []>} : vector<96x256xf32>, vector<256x128xf32>, vector<96x128xf32> -> vector<96x128xf32>
    %c0_3 = arith.constant 0 : index
    %c0_4 = arith.constant 0 : index
    %3 = vector.load %arg3[%c0_3, %c0_4] : memref<1x128xf32, #tpu.memory_space<vmem>>, vector<1x128xf32>
    %4 = vector.broadcast %3 : vector<1x128xf32> to vector<96x128xf32>
    %5 = arith.addf %2, %4 : vector<96x128xf32>
    %c0_5 = arith.constant 0 : index
    %c0_6 = arith.constant 0 : index
    %6 = vector.load %arg4[%c0_5, %c0_6] : memref<96x128xf32, #tpu.memory_space<vmem>>, vector<96x128xf32>
    tpu.vector_store %arg4[%c0_5, %c0_6], %5 {strides = array<i32>} : memref<96x128xf32, #tpu.memory_space<vmem>>, vector<96x128xf32>,
    return
  }
  func.func @transform_0(%arg0: i32) -> (i32, i32) {
    %c0_i32 = arith.constant 0 : i32
    %c0_i32_0 = arith.constant 0 : i32
    return %arg0, %c0_i32 : i32, i32
  }
  func.func @transform_1(%arg0: i32) -> (i32, i32) {
    %c0_i32 = arith.constant 0 : i32
    %c0_i32_0 = arith.constant 0 : i32
    %c0_i32_1 = arith.constant 0 : i32
    return %c0_i32, %c0_i32_0 : i32, i32
  }
  func.func @transform_2(%arg0: i32) -> (i32, i32) {
    %c0_i32 = arith.constant 0 : i32
    %c0_i32_0 = arith.constant 0 : i32
    %c0_i32_1 = arith.constant 0 : i32
    return %c0_i32, %c0_i32_0 : i32, i32
  }
  func.func @transform_3(%arg0: i32) -> (i32, i32) {
    %c0_i32 = arith.constant 0 : i32
    %c0_i32_0 = arith.constant 0 : i32
    return %arg0, %c0_i32 : i32, i32
  }
}

</mosaic_0001>

<bundles_post_ra>
// kernel: point_pillar_mash_forward.3
= control target key start
LH: loop header
LB: loop body
LE: loop exit
PB: predicated region body
PF: predicated region fallthrough
CT: control target
= control target key end

     0   :  { %s788_s12 = smov 0   ;;  %s1100_s0 = inlined_call_operand.vmem [shape: f32[384,256], index: 0, kind: input, shape index: {}]   ;;  %s1101_s1 = inlined_call_operand.vmem [shape: f32[256,64], index: 1, kind: input, shape index: {}]   ;;  %s1102_s2 = inlined_call_operand.vmem [shape: f32[1,64], index: 2, kind: input, shape index: {}]   ;;  %s1103_s3 = inlined_call_operand.vmem [shape: bf16[384,64], index: 3, kind: output, shape index: {}]  }
   0x1 LB: > { %s626_s13 = sadd.s32 4294967295, %s765_s12   ;;  %p630_p0 = scmp.ge.s32.totalorder %s765_s12, 1  ;;  %s765_s12 = sphi %s788_s12, %s13_s12  }
   0x2   : > { %p139_p1 = scmp.lt.s32.totalorder %s765_s12, 3 }
   0x4   : > { %p140_p2 = pnand %p630_p0, %p139_p1 }
   0x5   : > { %s164_s8 = smul.u32 (!%p140_p2), 24, %s626_s13 }
   0x6   : > { %143 = sbr.rel (%p140_p2) target bundleno = 319 (0x13f), region = 32 }
   0x7   : > { %p165_p3 = scmp.lt.s32.totalorder (!%p140_p2), %s164_s8, 47 }
   0xb   : > { %v240_v0 = vld [vmem:[%s1101_s1 + $0x78] sm:$0xff]  ;;  %v767_v1 = vmov 0.0   ;;  %v239_v2 = vld [vmem:[%s1101_s1 + $0x70] sm:$0xff]  ;;  %v238_v3 = vld [vmem:[%s1101_s1 + $0x68] sm:$0xff]  ;;  %s1105_s8 = smov (!%p165_p3, %s164_s8), 47  ;;  %vm545_vm0 = vcmask 519168  }
   0xc   : > { %264 = vmatprep.subr.mxu0 %v767_v1  ;;  %686 = vmatprep.subr.mxu1 %v767_v1  ;;  %v237_v4 = vld [vmem:[%s1101_s1 + $0x60] sm:$0xff]  ;;  %v236_v5 = vld [vmem:[%s1101_s1 + $0x58] sm:$0xff]  ;;  %v235_v6 = vld [vmem:[%s1101_s1 + $0x50] sm:$0xff]  ;;  %s661_s22 = sshll.u32 %s1105_s8, 4  ;;  %s633_s7 = sshll.u32 %s1105_s8, 2 }
   0xd   : > { %265 = vmatpush1.msra.mxu0 %v240_v0  ;;  %718 = vmatpush1.msra.mxu1 %v240_v0  ;;  %v234_v7 = vld [vmem:[%s1101_s1 + $0x48] sm:$0xff]  ;;  %v233_v8 = vld [vmem:[%s1101_s1 + $0x40] sm:$0xff]  ;;  %v232_v9 = vld [vmem:[%s1101_s1 + $0x38] sm:$0xff]  ;;  %s957_s29 = scalar_lea.vmem %s1100_s0, %s661_s22  ;;  %s1025_s11 = scalar_lea.vmem %s1103_s3, %s633_s7 }
   0xe   : > { %266 = vmatprep.subr.mxu0 %v767_v1  ;;  %687 = vmatprep.subr.mxu1 %v767_v1  ;;  %v231_v10 = vld [vmem:[%s1101_s1 + $0x30] sm:$0xff]  ;;  %v230_v11 = vld [vmem:[%s1101_s1 + $0x28] sm:$0xff]  ;;  %v229_v12 = vld [vmem:[%s1101_s1 + $0x20] sm:$0xff] }
   0xf   : > { %267 = vmatpush1.msra.mxu0 %v239_v2  ;;  %719 = vmatpush1.msra.mxu1 %v239_v2  ;;  %v228_v13 = vld [vmem:[%s1101_s1 + $0x18] sm:$0xff]  ;;  %v227_v14 = vld [vmem:[%s1101_s1 + $0x10] sm:$0xff]  ;;  %v226_v15 = vld [vmem:[%s1101_s1 + $0x8] sm:$0xff] }
  0x10   : > { %268 = vmatprep.subr.mxu0 %v767_v1  ;;  %688 = vmatprep.subr.mxu1 %v767_v1  ;;  %v225_v16 = vld [vmem:[%s1101_s1] sm:$0xff]  ;;  %v256_v17 = vld [vmem:[%s1101_s1 + $0xf8] sm:$0xff]  ;;  %v255_v18 = vld [vmem:[%s1101_s1 + $0xf0] sm:$0xff] }
  0x11   : > { %269 = vmatpush1.msra.mxu0 %v238_v3  ;;  %720 = vmatpush1.msra.mxu1 %v238_v3  ;;  %v254_v19 = vld [vmem:[%s1101_s1 + $0xe8] sm:$0xff]  ;;  %v253_v20 = vld [vmem:[%s1101_s1 + $0xe0] sm:$0xff]  ;;  %v252_v21 = vld [vmem:[%s1101_s1 + $0xd8] sm:$0xff] }
  0x12   : > { %270 = vmatprep.subr.mxu0 %v767_v1  ;;  %689 = vmatprep.subr.mxu1 %v767_v1  ;;  %v251_v22 = vld [vmem:[%s1101_s1 + $0xd0] sm:$0xff]  ;;  %v250_v23 = vld [vmem:[%s1101_s1 + $0xc8] sm:$0xff]  ;;  %v249_v24 = vld [vmem:[%s1101_s1 + $0xc0] sm:$0xff] }
  0x13   : > { %271 = vmatpush1.msra.mxu0 %v237_v4  ;;  %721 = vmatpush1.msra.mxu1 %v237_v4  ;;  %v248_v25 = vld [vmem:[%s1101_s1 + $0xb8] sm:$0xff]  ;;  %v247_v26 = vld [vmem:[%s1101_s1 + $0xb0] sm:$0xff]  ;;  %v246_v27 = vld [vmem:[%s1101_s1 + $0xa8] sm:$0xff] }
  0x14   : > { %272 = vmatprep.subr.mxu0 %v767_v1  ;;  %690 = vmatprep.subr.mxu1 %v767_v1  ;;  %v245_v28 = vld [vmem:[%s1101_s1 + $0xa0] sm:$0xff]  ;;  %v244_v29 = vld [vmem:[%s1101_s1 + $0x98] sm:$0xff]  ;;  %v243_v30 = vld [vmem:[%s1101_s1 + $0x90] sm:$0xff] }
  0x15   : > { %273 = vmatpush1.msra.mxu0 %v236_v5  ;;  %722 = vmatpush1.msra.mxu1 %v236_v5  ;;  %v242_v31 = vld [vmem:[%s1101_s1 + $0x88] sm:$0xff]  ;;  %v241_v32 = vld [vmem:[%s1101_s1 + $0x80] sm:$0xff]  ;;  %v180_v37 = vld [vmem:[%s957_s29 + $0x18] sm:$0xff] }
  0x16   : > { %274 = vmatprep.subr.mxu0 %v767_v1  ;;  %691 = vmatprep.subr.mxu1 %v767_v1  ;;  %v178_v33 = vld [vmem:[%s957_s29 + $0x8] sm:$0xff]  ;;  %v177_v35 = vld [vmem:[%s957_s29] sm:$0xff]  ;;  %v204_v38 = vld [vmem:[%s957_s29 + $0xd8] sm:$0xff] }
  0x17   : > { %275 = vmatpush1.msra.mxu0 %v235_v6  ;;  %723 = vmatpush1.msra.mxu1 %v235_v6  ;;  %v202_v34 = vld [vmem:[%s957_s29 + $0xc8] sm:$0xff]  ;;  %v201_v36 = vld [vmem:[%s957_s29 + $0xc0] sm:$0xff]  ;;  %v179_v39 = vld [vmem:[%s957_s29 + $0x10] sm:$0xff] }
  0x18   : > { %276 = vmatprep.subr.mxu0 %v767_v1  ;;  %692 = vmatprep.subr.mxu1 %v767_v1  ;;  %v203_v40 = vld [vmem:[%s957_s29 + $0xd0] sm:$0xff]  ;;  %v182_v41 = vld [vmem:[%s957_s29 + $0x28] sm:$0xff]  ;;  %v181_v43 = vld [vmem:[%s957_s29 + $0x20] sm:$0xff] }
  0x19   : > { %277 = vmatpush1.msra.mxu0 %v234_v7  ;;  %724 = vmatpush1.msra.mxu1 %v234_v7  ;;  %v206_v42 = vld [vmem:[%s957_s29 + $0xe8] sm:$0xff]  ;;  %v205_v44 = vld [vmem:[%s957_s29 + $0xe0] sm:$0xff]  ;;  %v184_v45 = vld [vmem:[%s957_s29 + $0x38] sm:$0xff] }
  0x1a   : > { %278 = vmatprep.subr.mxu0 %v767_v1  ;;  %693 = vmatprep.subr.mxu1 %v767_v1  ;;  %v208_v46 = vld [vmem:[%s957_s29 + $0xf8] sm:$0xff]  ;;  %v183_v47 = vld [vmem:[%s957_s29 + $0x30] sm:$0xff]  ;;  %v186_v49 = vld [vmem:[%s957_s29 + $0x48] sm:$0xff] }
  0x1b   : > { %279 = vmatpush1.msra.mxu0 %v233_v8  ;;  %725 = vmatpush1.msra.mxu1 %v233_v8  ;;  %v207_v48 = vld [vmem:[%s957_s29 + $0xf0] sm:$0xff]  ;;  %v210_v50 = vld [vmem:[%s957_s29 + $0x108] sm:$0xff]  ;;  %v185_v51 = vld [vmem:[%s957_s29 + $0x40] sm:$0xff] }
  0x1c   : > { %280 = vmatprep.subr.mxu0 %v767_v1  ;;  %694 = vmatprep.subr.mxu1 %v767_v1  ;;  %v209_v52 = vld [vmem:[%s957_s29 + $0x100] sm:$0xff]  ;;  %v188_v53 = vld [vmem:[%s957_s29 + $0x58] sm:$0xff]  ;;  %v187_v55 = vld [vmem:[%s957_s29 + $0x50] sm:$0xff] }
  0x1d   : > { %281 = vmatpush1.msra.mxu0 %v232_v9  ;;  %726 = vmatpush1.msra.mxu1 %v232_v9  ;;  %v212_v54 = vld [vmem:[%s957_s29 + $0x118] sm:$0xff]  ;;  %v211_v56 = vld [vmem:[%s957_s29 + $0x110] sm:$0xff]  ;;  %v190_v57 = vld [vmem:[%s957_s29 + $0x68] sm:$0xff] }
  0x1e   : > { %282 = vmatprep.subr.mxu0 %v767_v1  ;;  %695 = vmatprep.subr.mxu1 %v767_v1  ;;  %v214_v58 = vld [vmem:[%s957_s29 + $0x128] sm:$0xff]  ;;  %v189_v59 = vld [vmem:[%s957_s29 + $0x60] sm:$0xff]  ;;  %v192_v61 = vld [vmem:[%s957_s29 + $0x78] sm:$0xff] }
  0x1f   : > { %283 = vmatpush1.msra.mxu0 %v231_v10  ;;  %727 = vmatpush1.msra.mxu1 %v231_v10  ;;  %v213_v60 = vld [vmem:[%s957_s29 + $0x120] sm:$0xff]  ;;  %v216_v62 = vld [vmem:[%s957_s29 + $0x138] sm:$0xff]  ;;  %v191_v63 = vld [vmem:[%s957_s29 + $0x70] sm:$0xff] }
  0x20   : > { %284 = vmatprep.subr.mxu0 %v767_v1  ;;  %696 = vmatprep.subr.mxu1 %v767_v1  ;;  %v215_v0 = vld [vmem:[%s957_s29 + $0x130] sm:$0xff]  ;;  %v218_v2 = vld [vmem:[%s957_s29 + $0x148] sm:$0xff]  ;;  %v193_v3 = vld [vmem:[%s957_s29 + $0x80] sm:$0xff] }
  0x21   : > { %285 = vmatpush1.msra.mxu0 %v230_v11  ;;  %728 = vmatpush1.msra.mxu1 %v230_v11  ;;  %v217_v4 = vld [vmem:[%s957_s29 + $0x140] sm:$0xff]  ;;  %v196_v5 = vld [vmem:[%s957_s29 + $0x98] sm:$0xff]  ;;  %v195_v7 = vld [vmem:[%s957_s29 + $0x90] sm:$0xff] }
  0x22   : > { %286 = vmatprep.subr.mxu0 %v767_v1  ;;  %697 = vmatprep.subr.mxu1 %v767_v1  ;;  %v220_v6 = vld [vmem:[%s957_s29 + $0x158] sm:$0xff]  ;;  %v219_v8 = vld [vmem:[%s957_s29 + $0x150] sm:$0xff]  ;;  %v198_v9 = vld [vmem:[%s957_s29 + $0xa8] sm:$0xff] }
  0x23   : > { %287 = vmatpush1.msra.mxu0 %v229_v12  ;;  %729 = vmatpush1.msra.mxu1 %v229_v12  ;;  %v222_v10 = vld [vmem:[%s957_s29 + $0x168] sm:$0xff]  ;;  %v197_v11 = vld [vmem:[%s957_s29 + $0xa0] sm:$0xff] }
  0x24   : > { %288 = vmatprep.subr.mxu0 %v767_v1  ;;  %698 = vmatprep.subr.mxu1 %v767_v1  ;;  %v221_v12 = vld [vmem:[%s957_s29 + $0x160] sm:$0xff] }
  0x25   : > { %289 = vmatpush1.msra.mxu0 %v228_v13  ;;  %730 = vmatpush1.msra.mxu1 %v228_v13  ;;  %v200_v13 = vld [vmem:[%s957_s29 + $0xb8] sm:$0xff] }
  0x26   : > { %290 = vmatprep.subr.mxu0 %v767_v1  ;;  %699 = vmatprep.subr.mxu1 %v767_v1 }
  0x27   : > { %291 = vmatpush1.msra.mxu0 %v227_v14  ;;  %731 = vmatpush1.msra.mxu1 %v227_v14  ;;  %v224_v14 = vld [vmem:[%s957_s29 + $0x178] sm:$0xff] }
  0x28   : > { %292 = vmatprep.subr.mxu0 %v767_v1  ;;  %700 = vmatprep.subr.mxu1 %v767_v1 }
  0x29   : > { %293 = vmatpush1.msra.mxu0 %v226_v15  ;;  %732 = vmatpush1.msra.mxu1 %v226_v15  ;;  %v199_v15 = vld [vmem:[%s957_s29 + $0xb0] sm:$0xff] }
  0x2a   : > { %294 = vmatprep.subr.mxu0 %v767_v1  ;;  %701 = vmatprep.subr.mxu1 %v767_v1 }
  0x2b   : > { %295 = vmatpush1.msra.mxu0 %v225_v16  ;;  %733 = vmatpush1.msra.mxu1 %v225_v16  ;;  %v223_v16 = vld [vmem:[%s957_s29 + $0x170] sm:$0xff] }
  0x2c   : > { %296 = vmatprep.subr.mxu0 %v767_v1  ;;  %702 = vmatprep.subr.mxu1 %v767_v1 }
  0x2d   : > { %297 = vmatpush2.msra.mxu0 %v256_v17  ;;  %734 = vmatpush2.msra.mxu1 %v256_v17  ;;  %v1017_v17 = vld [vmem:[%s1102_s2] ss:$0 sm:$0xff] }
  0x2e   : > { %298 = vmatprep.subr.mxu0 %v767_v1  ;;  %703 = vmatprep.subr.mxu1 %v767_v1 }
  0x2f   : > { %299 = vmatpush2.msra.mxu0 %v255_v18  ;;  %735 = vmatpush2.msra.mxu1 %v255_v18 }
  0x30   : > { %300 = vmatprep.subr.mxu0 %v767_v1  ;;  %704 = vmatprep.subr.mxu1 %v767_v1 }
  0x31   : > { %301 = vmatpush2.msra.mxu0 %v254_v19  ;;  %736 = vmatpush2.msra.mxu1 %v254_v19 }
  0x32   : > { %302 = vmatprep.subr.mxu0 %v767_v1  ;;  %705 = vmatprep.subr.mxu1 %v767_v1 }
  0x33   : > { %303 = vmatpush2.msra.mxu0 %v253_v20  ;;  %737 = vmatpush2.msra.mxu1 %v253_v20 }
  0x34   : > { %304 = vmatprep.subr.mxu0 %v767_v1  ;;  %706 = vmatprep.subr.mxu1 %v767_v1 }
  0x35   : > { %305 = vmatpush2.msra.mxu0 %v252_v21  ;;  %738 = vmatpush2.msra.mxu1 %v252_v21 }
  0x36   : > { %306 = vmatprep.subr.mxu0 %v767_v1  ;;  %707 = vmatprep.subr.mxu1 %v767_v1 }
  0x37   : > { %307 = vmatpush2.msra.mxu0 %v251_v22  ;;  %739 = vmatpush2.msra.mxu1 %v251_v22 }
  0x38   : > { %308 = vmatprep.subr.mxu0 %v767_v1  ;;  %708 = vmatprep.subr.mxu1 %v767_v1 }
  0x39   : > { %309 = vmatpush2.msra.mxu0 %v250_v23  ;;  %740 = vmatpush2.msra.mxu1 %v250_v23 }
  0x3a   : > { %310 = vmatprep.subr.mxu0 %v767_v1  ;;  %709 = vmatprep.subr.mxu1 %v767_v1 }
  0x3b   : > { %311 = vmatpush2.msra.mxu0 %v249_v24  ;;  %741 = vmatpush2.msra.mxu1 %v249_v24 }
  0x3c   : > { %312 = vmatprep.subr.mxu0 %v767_v1  ;;  %710 = vmatprep.subr.mxu1 %v767_v1 }
  0x3d   : > { %313 = vmatpush2.msra.mxu0 %v248_v25  ;;  %742 = vmatpush2.msra.mxu1 %v248_v25 }
  0x3e   : > { %314 = vmatprep.subr.mxu0 %v767_v1  ;;  %711 = vmatprep.subr.mxu1 %v767_v1 }
  0x3f   : > { %315 = vmatpush2.msra.mxu0 %v247_v26  ;;  %743 = vmatpush2.msra.mxu1 %v247_v26 }
  0x40   : > { %316 = vmatprep.subr.mxu0 %v767_v1  ;;  %712 = vmatprep.subr.mxu1 %v767_v1 }
  0x41   : > { %317 = vmatpush2.msra.mxu0 %v246_v27  ;;  %744 = vmatpush2.msra.mxu1 %v246_v27 }
  0x42   : > { %318 = vmatprep.subr.mxu0 %v767_v1  ;;  %713 = vmatprep.subr.mxu1 %v767_v1 }
  0x43   : > { %319 = vmatpush2.msra.mxu0 %v245_v28  ;;  %745 = vmatpush2.msra.mxu1 %v245_v28 }
  0x44   : > { %320 = vmatprep.subr.mxu0 %v767_v1  ;;  %714 = vmatprep.subr.mxu1 %v767_v1 }
  0x45   : > { %321 = vmatpush2.msra.mxu0 %v244_v29  ;;  %746 = vmatpush2.msra.mxu1 %v244_v29 }
  0x46   : > { %322 = vmatprep.subr.mxu0 %v767_v1  ;;  %715 = vmatprep.subr.mxu1 %v767_v1 }
  0x47   : > { %323 = vmatpush2.msra.mxu0 %v243_v30  ;;  %747 = vmatpush2.msra.mxu1 %v243_v30 }
  0x48   : > { %324 = vmatprep.subr.mxu0 %v767_v1  ;;  %716 = vmatprep.subr.mxu1 %v767_v1 }
  0x49   : > { %325 = vmatpush2.msra.mxu0 %v242_v31  ;;  %748 = vmatpush2.msra.mxu1 %v242_v31 }
  0x4a   : > { %326 = vmatprep.subr.mxu0 %v767_v1  ;;  %717 = vmatprep.subr.mxu1 %v767_v1  ;;  %v194_v1 = vld [vmem:[%s957_s29 + $0x88] sm:$0xff] }
  0x4b   : > { %327 = vmatpush2.msra.mxu0 %v241_v32  ;;  %749 = vmatpush2.msra.mxu1 %v241_v32 }
  0x4c   : > { %328 = vmatprep.mubr.f32.mxu0 %v178_v33  ;;  %388 = vmatprep.mubr.f32.mxu1 %v202_v34 }
  0x4d   : > { %329 = vmatmul.mubr.f32.vlgmr.msra.gmra.mxu0 %v177_v35  ;;  %389 = vmatmul.mubr.f32.vlgmr.msra.gmra.mxu1 %v201_v36 }
  0x4e   : > { %333 = vmatprep.mubr.f32.mxu0 %v180_v37  ;;  %393 = vmatprep.mubr.f32.mxu1 %v204_v38 }
  0x51   : > { %334 = vmatmul.mubr.f32.gmra.mxu0 %v179_v39  ;;  %394 = vmatmul.mubr.f32.gmra.mxu1 %v203_v40 }
  0x52   : > { %338 = vmatprep.mubr.f32.mxu0 %v182_v41  ;;  %398 = vmatprep.mubr.f32.mxu1 %v206_v42 }
  0x55   : > { %339 = vmatmul.mubr.f32.gmra.mxu0 %v181_v43  ;;  %399 = vmatmul.mubr.f32.gmra.mxu1 %v205_v44 }
  0x56   : > { %343 = vmatprep.mubr.f32.mxu0 %v184_v45  ;;  %403 = vmatprep.mubr.f32.mxu1 %v208_v46 }
  0x59   : > { %344 = vmatmul.mubr.f32.gmra.mxu0 %v183_v47  ;;  %404 = vmatmul.mubr.f32.gmra.mxu1 %v207_v48 }
  0x5a   : > { %348 = vmatprep.mubr.f32.mxu0 %v186_v49  ;;  %408 = vmatprep.mubr.f32.mxu1 %v210_v50 }
  0x5d   : > { %349 = vmatmul.mubr.f32.gmra.mxu0 %v185_v51  ;;  %409 = vmatmul.mubr.f32.gmra.mxu1 %v209_v52 }
  0x5e   : > { %353 = vmatprep.mubr.f32.mxu0 %v188_v53  ;;  %413 = vmatprep.mubr.f32.mxu1 %v212_v54 }
  0x61   : > { %354 = vmatmul.mubr.f32.gmra.mxu0 %v187_v55  ;;  %414 = vmatmul.mubr.f32.gmra.mxu1 %v211_v56 }
  0x62   : > { %358 = vmatprep.mubr.f32.mxu0 %v190_v57  ;;  %418 = vmatprep.mubr.f32.mxu1 %v214_v58 }
  0x65   : > { %359 = vmatmul.mubr.f32.gmra.mxu0 %v189_v59  ;;  %419 = vmatmul.mubr.f32.gmra.mxu1 %v213_v60 }
  0x66   : > { %363 = vmatprep.mubr.f32.mxu0 %v192_v61  ;;  %423 = vmatprep.mubr.f32.mxu1 %v216_v62 }
  0x69   : > { %364 = vmatmul.mubr.f32.gmra.mxu0 %v191_v63  ;;  %424 = vmatmul.mubr.f32.gmra.mxu1 %v215_v0 }
  0x6a   : > { %368 = vmatprep.mubr.f32.mxu0 %v194_v1  ;;  %428 = vmatprep.mubr.f32.mxu1 %v218_v2 }
  0x6d   : > { %369 = vmatmul.mubr.f32.gmra.mxu0 %v193_v3  ;;  %429 = vmatmul.mubr.f32.gmra.mxu1 %v217_v4 }
  0x6e   : > { %373 = vmatprep.mubr.f32.mxu0 %v196_v5  ;;  %433 = vmatprep.mubr.f32.mxu1 %v220_v6 }
  0x71   : > { %374 = vmatmul.mubr.f32.gmra.mxu0 %v195_v7  ;;  %434 = vmatmul.mubr.f32.gmra.mxu1 %v219_v8 }
  0x72   : > { %378 = vmatprep.mubr.f32.mxu0 %v198_v9  ;;  %438 = vmatprep.mubr.f32.mxu1 %v222_v10 }
  0x75   : > { %379 = vmatmul.mubr.f32.gmra.mxu0 %v197_v11  ;;  %439 = vmatmul.mubr.f32.gmra.mxu1 %v221_v12 }
  0x76   : > { %383 = vmatprep.mubr.f32.mxu0 %v200_v13  ;;  %443 = vmatprep.mubr.f32.mxu1 %v224_v14 }
  0x79   : > { %384 = vmatmul.mubr.f32.gmra.mxu0 %v199_v15  ;;  %444 = vmatmul.mubr.f32.gmra.mxu1 %v223_v16 }
 0x10d   : > { %v330_v18 = vpop.f32.mrf.mxu0  ;;  %v390_v19 = vpop.f32.mrf.mxu1 }
 0x10e   : > { %v331_v20 = vadd.f32 %v1017_v17, %v330_v18  ;;  %v391_v21 = vadd.f32 %v1017_v17, %v390_v19 }
 0x10f   : > { %v332_v22 = vpop.f32.mrf.mxu0  ;;  %v392_v23 = vpop.f32.mrf.mxu1 }
 0x110   : > { %v662_v24 = vpack.c.bf16 %v331_v20, %v331_v20  ;;  %v674_v25 = vpack.c.bf16 %v391_v21, %v391_v21 }
 0x111   : > { %v335_v26 = vpop.f32.mrf.mxu0  ;;  %v395_v27 = vpop.f32.mrf.mxu1 }
 0x112   : > { %546 = vst.msk [vmem:[%s1025_s11] sm:$0xf] %vm545_vm0, %v662_v24  ;;  %558 = vst.msk [vmem:[%s1025_s11 + $0x30] sm:$0xf] %vm545_vm0, %v674_v25  ;;  %v336_v28 = vadd.f32 %v1017_v17, %v335_v26  ;;  %v396_v29 = vadd.f32 %v1017_v17, %v395_v27 }
 0x113   : > { %v337_v30 = vpop.f32.mrf.mxu0  ;;  %v397_v31 = vpop.f32.mrf.mxu1 }
 0x114   : > { %v663_v32 = vpack.c.bf16 %v336_v28, %v336_v28  ;;  %v675_v33 = vpack.c.bf16 %v396_v29, %v396_v29 }
 0x115   : > { %v340_v34 = vpop.f32.mrf.mxu0  ;;  %v400_v35 = vpop.f32.mrf.mxu1 }
 0x116   : > { %547 = vst.msk [vmem:[%s1025_s11 + $0x4] sm:$0xf] %vm545_vm0, %v663_v32  ;;  %559 = vst.msk [vmem:[%s1025_s11 + $0x34] sm:$0xf] %vm545_vm0, %v675_v33  ;;  %v341_v36 = vadd.f32 %v1017_v17, %v340_v34  ;;  %v401_v37 = vadd.f32 %v1017_v17, %v400_v35 }
 0x117   : > { %v342_v38 = vpop.f32.mrf.mxu0  ;;  %v402_v39 = vpop.f32.mrf.mxu1 }
 0x118   : > { %v664_v40 = vpack.c.bf16 %v341_v36, %v341_v36  ;;  %v676_v41 = vpack.c.bf16 %v401_v37, %v401_v37 }
 0x119   : > { %v345_v42 = vpop.f32.mrf.mxu0  ;;  %v405_v43 = vpop.f32.mrf.mxu1 }
 0x11a   : > { %548 = vst.msk [vmem:[%s1025_s11 + $0x8] sm:$0xf] %vm545_vm0, %v664_v40  ;;  %560 = vst.msk [vmem:[%s1025_s11 + $0x38] sm:$0xf] %vm545_vm0, %v676_v41  ;;  %v346_v44 = vadd.f32 %v1017_v17, %v345_v42  ;;  %v406_v45 = vadd.f32 %v1017_v17, %v405_v43 }
 0x11b   : > { %v347_v46 = vpop.f32.mrf.mxu0  ;;  %v407_v47 = vpop.f32.mrf.mxu1 }
 0x11c   : > { %v665_v48 = vpack.c.bf16 %v346_v44, %v346_v44  ;;  %v677_v49 = vpack.c.bf16 %v406_v45, %v406_v45 }
 0x11d   : > { %v350_v50 = vpop.f32.mrf.mxu0  ;;  %v410_v51 = vpop.f32.mrf.mxu1 }
 0x11e   : > { %549 = vst.msk [vmem:[%s1025_s11 + $0xc] sm:$0xf] %vm545_vm0, %v665_v48  ;;  %561 = vst.msk [vmem:[%s1025_s11 + $0x3c] sm:$0xf] %vm545_vm0, %v677_v49  ;;  %v351_v52 = vadd.f32 %v1017_v17, %v350_v50  ;;  %v411_v53 = vadd.f32 %v1017_v17, %v410_v51 }
 0x11f   : > { %v352_v54 = vpop.f32.mrf.mxu0  ;;  %v412_v55 = vpop.f32.mrf.mxu1 }
 0x120   : > { %v666_v56 = vpack.c.bf16 %v351_v52, %v351_v52  ;;  %v678_v57 = vpack.c.bf16 %v411_v53, %v411_v53 }
 0x121   : > { %v355_v58 = vpop.f32.mrf.mxu0  ;;  %v415_v59 = vpop.f32.mrf.mxu1 }
 0x122   : > { %550 = vst.msk [vmem:[%s1025_s11 + $0x10] sm:$0xf] %vm545_vm0, %v666_v56  ;;  %562 = vst.msk [vmem:[%s1025_s11 + $0x40] sm:$0xf] %vm545_vm0, %v678_v57  ;;  %v356_v60 = vadd.f32 %v1017_v17, %v355_v58  ;;  %v416_v61 = vadd.f32 %v1017_v17, %v415_v59 }
 0x123   : > { %v357_v62 = vpop.f32.mrf.mxu0  ;;  %v417_v63 = vpop.f32.mrf.mxu1 }
 0x124   : > { %v667_v0 = vpack.c.bf16 %v356_v60, %v356_v60  ;;  %v679_v1 = vpack.c.bf16 %v416_v61, %v416_v61 }
 0x125   : > { %v360_v2 = vpop.f32.mrf.mxu0  ;;  %v420_v3 = vpop.f32.mrf.mxu1 }
 0x126   : > { %551 = vst.msk [vmem:[%s1025_s11 + $0x14] sm:$0xf] %vm545_vm0, %v667_v0  ;;  %563 = vst.msk [vmem:[%s1025_s11 + $0x44] sm:$0xf] %vm545_vm0, %v679_v1  ;;  %v361_v4 = vadd.f32 %v1017_v17, %v360_v2  ;;  %v421_v5 = vadd.f32 %v1017_v17, %v420_v3 }
 0x127   : > { %v362_v6 = vpop.f32.mrf.mxu0  ;;  %v422_v7 = vpop.f32.mrf.mxu1 }
 0x128   : > { %v668_v8 = vpack.c.bf16 %v361_v4, %v361_v4  ;;  %v680_v9 = vpack.c.bf16 %v421_v5, %v421_v5 }
 0x129   : > { %v365_v10 = vpop.f32.mrf.mxu0  ;;  %v425_v11 = vpop.f32.mrf.mxu1 }
 0x12a   : > { %552 = vst.msk [vmem:[%s1025_s11 + $0x18] sm:$0xf] %vm545_vm0, %v668_v8  ;;  %564 = vst.msk [vmem:[%s1025_s11 + $0x48] sm:$0xf] %vm545_vm0, %v680_v9  ;;  %v366_v12 = vadd.f32 %v1017_v17, %v365_v10  ;;  %v426_v13 = vadd.f32 %v1017_v17, %v425_v11 }
 0x12b   : > { %v367_v14 = vpop.f32.mrf.mxu0  ;;  %v427_v15 = vpop.f32.mrf.mxu1 }
 0x12c   : > { %v669_v16 = vpack.c.bf16 %v366_v12, %v366_v12  ;;  %v681_v18 = vpack.c.bf16 %v426_v13, %v426_v13 }
 0x12d   : > { %v370_v19 = vpop.f32.mrf.mxu0  ;;  %v430_v20 = vpop.f32.mrf.mxu1 }
 0x12e   : > { %553 = vst.msk [vmem:[%s1025_s11 + $0x1c] sm:$0xf] %vm545_vm0, %v669_v16  ;;  %565 = vst.msk [vmem:[%s1025_s11 + $0x4c] sm:$0xf] %vm545_vm0, %v681_v18  ;;  %v371_v21 = vadd.f32 %v1017_v17, %v370_v19  ;;  %v431_v22 = vadd.f32 %v1017_v17, %v430_v20 }
 0x12f   : > { %v372_v23 = vpop.f32.mrf.mxu0  ;;  %v432_v24 = vpop.f32.mrf.mxu1 }
 0x130   : > { %v670_v25 = vpack.c.bf16 %v371_v21, %v371_v21  ;;  %v682_v26 = vpack.c.bf16 %v431_v22, %v431_v22 }
 0x131   : > { %v375_v27 = vpop.f32.mrf.mxu0  ;;  %v435_v28 = vpop.f32.mrf.mxu1 }
 0x132   : > { %554 = vst.msk [vmem:[%s1025_s11 + $0x20] sm:$0xf] %vm545_vm0, %v670_v25  ;;  %566 = vst.msk [vmem:[%s1025_s11 + $0x50] sm:$0xf] %vm545_vm0, %v682_v26  ;;  %v376_v29 = vadd.f32 %v1017_v17, %v375_v27  ;;  %v436_v30 = vadd.f32 %v1017_v17, %v435_v28 }
 0x133   : > { %v377_v31 = vpop.f32.mrf.mxu0  ;;  %v437_v32 = vpop.f32.mrf.mxu1 }
 0x134   : > { %v671_v33 = vpack.c.bf16 %v376_v29, %v376_v29  ;;  %v683_v34 = vpack.c.bf16 %v436_v30, %v436_v30 }
 0x135   : > { %v380_v35 = vpop.f32.mrf.mxu0  ;;  %v440_v36 = vpop.f32.mrf.mxu1 }
 0x136   : > { %555 = vst.msk [vmem:[%s1025_s11 + $0x24] sm:$0xf] %vm545_vm0, %v671_v33  ;;  %567 = vst.msk [vmem:[%s1025_s11 + $0x54] sm:$0xf] %vm545_vm0, %v683_v34  ;;  %v381_v37 = vadd.f32 %v1017_v17, %v380_v35  ;;  %v441_v38 = vadd.f32 %v1017_v17, %v440_v36 }
 0x137   : > { %v382_v39 = vpop.f32.mrf.mxu0  ;;  %v442_v40 = vpop.f32.mrf.mxu1 }
 0x138   : > { %v672_v41 = vpack.c.bf16 %v381_v37, %v381_v37  ;;  %v684_v42 = vpack.c.bf16 %v441_v38, %v441_v38 }
 0x139   : > { %v385_v43 = vpop.f32.mrf.mxu0  ;;  %v445_v44 = vpop.f32.mrf.mxu1 }
 0x13a   : > { %556 = vst.msk [vmem:[%s1025_s11 + $0x28] sm:$0xf] %vm545_vm0, %v672_v41  ;;  %568 = vst.msk [vmem:[%s1025_s11 + $0x58] sm:$0xf] %vm545_vm0, %v684_v42  ;;  %v386_v45 = vadd.f32 %v1017_v17, %v385_v43  ;;  %v446_v46 = vadd.f32 %v1017_v17, %v445_v44 }
 0x13b   : > { %v387_v47 = vpop.f32.mrf.mxu0  ;;  %v447_v48 = vpop.f32.mrf.mxu1 }
 0x13c   : > { %v673_v49 = vpack.c.bf16 %v386_v45, %v386_v45  ;;  %v685_v50 = vpack.c.bf16 %v446_v46, %v446_v46 }
 0x13e   : > { %557 = vst.msk [vmem:[%s1025_s11 + $0x2c] sm:$0xf] %vm545_vm0, %v673_v49  ;;  %569 = vst.msk [vmem:[%s1025_s11 + $0x5c] sm:$0xf] %vm545_vm0, %v685_v50 }
 0x13f PF: > { %s13_s12 = sadd.s32 1, %s765_s12  }
 0x140   : > { %p10_p4 = scmp.ge.s32.totalorder %s13_s12, 4  }
 0x142   :  { %12 = sbr.rel (!%p10_p4) target bundleno = 1 (0x1), region = 62 }

// kernel: point_pillar_mash_forward.5
= control target key start
LH: loop header
LB: loop body
LE: loop exit
PB: predicated region body
PF: predicated region fallthrough
CT: control target
= control target key end

     0   :  { %s581_s12 = smov 0   ;;  %s743_s0 = inlined_call_operand.vmem [shape: f32[192,256], index: 0, kind: input, shape index: {}]   ;;  %s744_s1 = inlined_call_operand.vmem [shape: f32[256,128], index: 1, kind: input, shape index: {}]   ;;  %s745_s2 = inlined_call_operand.vmem [shape: f32[1,128], index: 2, kind: input, shape index: {}]   ;;  %s746_s3 = inlined_call_operand.vmem [shape: f32[192,128], index: 3, kind: output, shape index: {}]  }
   0x1 LB: > { %s433_s13 = sadd.s32 4294967295, %s559_s12   ;;  %p437_p0 = scmp.ge.s32.totalorder %s559_s12, 1  ;;  %s559_s12 = sphi %s581_s12, %s13_s12  }
   0x2   : > { %p139_p1 = scmp.lt.s32.totalorder %s559_s12, 3 }
   0x4   : > { %p140_p2 = pnand %p437_p0, %p139_p1 }
   0x5   : > { %s164_s19 = smul.u32 (!%p140_p2), 12, %s433_s13 }
   0x6   : > { %143 = sbr.rel (%p140_p2) target bundleno = 265 (0x109), region = 32 }
   0x7   : > { %p165_p3 = scmp.lt.s32.totalorder (!%p140_p2), %s164_s19, 23 }
   0xb   : > { %v232_v0 = vld [vmem:[%s744_s1 + $0xf8] sm:$0xff]  ;;  %v231_v2 = vld [vmem:[%s744_s1 + $0xf0] sm:$0xff]  ;;  %v230_v4 = vld [vmem:[%s744_s1 + $0xe8] sm:$0xff]  ;;  %s748_s19 = smov (!%p165_p3, %s164_s19), 23 }
   0xc   : > { %v216_v1 = vld [vmem:[%s744_s1 + $0x78] sm:$0xff]  ;;  %445 = vmatprep.subr.mxu0 %v232_v0  ;;  %513 = vmatprep.subr.mxu1 %v232_v0  ;;  %v215_v3 = vld [vmem:[%s744_s1 + $0x70] sm:$0xff]  ;;  %v214_v5 = vld [vmem:[%s744_s1 + $0x68] sm:$0xff]  ;;  %s444_s18 = sshll.u32 %s748_s19, 4  ;;  %s440_s5 = sshll.u32 %s748_s19, 3 }
   0xd   : > { %446 = vmatpush3.msra.mxu0 %v216_v1  ;;  %529 = vmatpush3.msra.mxu1 %v216_v1  ;;  %v229_v6 = vld [vmem:[%s744_s1 + $0xe0] sm:$0xff]  ;;  %v228_v8 = vld [vmem:[%s744_s1 + $0xd8] sm:$0xff]  ;;  %v227_v10 = vld [vmem:[%s744_s1 + $0xd0] sm:$0xff]  ;;  %s687_s27 = scalar_lea.vmem %s743_s0, %s444_s18  ;;  %s726_s10 = scalar_lea.vmem %s746_s3, %s440_s5 }
   0xe   : > { %447 = vmatprep.subr.mxu0 %v231_v2  ;;  %514 = vmatprep.subr.mxu1 %v231_v2  ;;  %v213_v7 = vld [vmem:[%s744_s1 + $0x60] sm:$0xff]  ;;  %v212_v9 = vld [vmem:[%s744_s1 + $0x58] sm:$0xff]  ;;  %v211_v11 = vld [vmem:[%s744_s1 + $0x50] sm:$0xff] }
   0xf   : > { %448 = vmatpush3.msra.mxu0 %v215_v3  ;;  %530 = vmatpush3.msra.mxu1 %v215_v3  ;;  %v226_v12 = vld [vmem:[%s744_s1 + $0xc8] sm:$0xff]  ;;  %v225_v14 = vld [vmem:[%s744_s1 + $0xc0] sm:$0xff]  ;;  %v224_v16 = vld [vmem:[%s744_s1 + $0xb8] sm:$0xff] }
  0x10   : > { %449 = vmatprep.subr.mxu0 %v230_v4  ;;  %515 = vmatprep.subr.mxu1 %v230_v4  ;;  %v210_v13 = vld [vmem:[%s744_s1 + $0x48] sm:$0xff]  ;;  %v209_v15 = vld [vmem:[%s744_s1 + $0x40] sm:$0xff]  ;;  %v208_v17 = vld [vmem:[%s744_s1 + $0x38] sm:$0xff] }
  0x11   : > { %450 = vmatpush3.msra.mxu0 %v214_v5  ;;  %531 = vmatpush3.msra.mxu1 %v214_v5  ;;  %v223_v18 = vld [vmem:[%s744_s1 + $0xb0] sm:$0xff]  ;;  %v222_v20 = vld [vmem:[%s744_s1 + $0xa8] sm:$0xff]  ;;  %v221_v22 = vld [vmem:[%s744_s1 + $0xa0] sm:$0xff] }
  0x12   : > { %451 = vmatprep.subr.mxu0 %v229_v6  ;;  %516 = vmatprep.subr.mxu1 %v229_v6  ;;  %v207_v19 = vld [vmem:[%s744_s1 + $0x30] sm:$0xff]  ;;  %v206_v21 = vld [vmem:[%s744_s1 + $0x28] sm:$0xff]  ;;  %v205_v23 = vld [vmem:[%s744_s1 + $0x20] sm:$0xff] }
  0x13   : > { %452 = vmatpush3.msra.mxu0 %v213_v7  ;;  %532 = vmatpush3.msra.mxu1 %v213_v7  ;;  %v220_v24 = vld [vmem:[%s744_s1 + $0x98] sm:$0xff]  ;;  %v219_v26 = vld [vmem:[%s744_s1 + $0x90] sm:$0xff]  ;;  %v218_v28 = vld [vmem:[%s744_s1 + $0x88] sm:$0xff] }
  0x14   : > { %453 = vmatprep.subr.mxu0 %v228_v8  ;;  %517 = vmatprep.subr.mxu1 %v228_v8  ;;  %v204_v25 = vld [vmem:[%s744_s1 + $0x18] sm:$0xff]  ;;  %v203_v27 = vld [vmem:[%s744_s1 + $0x10] sm:$0xff]  ;;  %v202_v29 = vld [vmem:[%s744_s1 + $0x8] sm:$0xff] }
  0x15   : > { %454 = vmatpush3.msra.mxu0 %v212_v9  ;;  %533 = vmatpush3.msra.mxu1 %v212_v9  ;;  %v217_v30 = vld [vmem:[%s744_s1 + $0x80] sm:$0xff]  ;;  %v178_v32 = vld [vmem:[%s687_s27 + $0x8] sm:$0xff]  ;;  %v180_v36 = vld [vmem:[%s687_s27 + $0x18] sm:$0xff] }
  0x16   : > { %455 = vmatprep.subr.mxu0 %v227_v10  ;;  %518 = vmatprep.subr.mxu1 %v227_v10  ;;  %v201_v31 = vld [vmem:[%s744_s1] sm:$0xff]  ;;  %v190_v33 = vld [vmem:[%s687_s27 + $0x68] sm:$0xff]  ;;  %v192_v37 = vld [vmem:[%s687_s27 + $0x78] sm:$0xff] }
  0x17   : > { %456 = vmatpush3.msra.mxu0 %v211_v11  ;;  %534 = vmatpush3.msra.mxu1 %v211_v11  ;;  %v177_v34 = vld [vmem:[%s687_s27] sm:$0xff]  ;;  %v179_v38 = vld [vmem:[%s687_s27 + $0x10] sm:$0xff]  ;;  %v182_v40 = vld [vmem:[%s687_s27 + $0x28] sm:$0xff] }
  0x18   : > { %457 = vmatprep.subr.mxu0 %v226_v12  ;;  %519 = vmatprep.subr.mxu1 %v226_v12  ;;  %v189_v35 = vld [vmem:[%s687_s27 + $0x60] sm:$0xff]  ;;  %v191_v39 = vld [vmem:[%s687_s27 + $0x70] sm:$0xff]  ;;  %v194_v41 = vld [vmem:[%s687_s27 + $0x88] sm:$0xff] }
  0x19   : > { %458 = vmatpush3.msra.mxu0 %v210_v13  ;;  %535 = vmatpush3.msra.mxu1 %v210_v13  ;;  %v181_v42 = vld [vmem:[%s687_s27 + $0x20] sm:$0xff]  ;;  %v184_v44 = vld [vmem:[%s687_s27 + $0x38] sm:$0xff]  ;;  %v183_v46 = vld [vmem:[%s687_s27 + $0x30] sm:$0xff] }
  0x1a   : > { %459 = vmatprep.subr.mxu0 %v225_v14  ;;  %520 = vmatprep.subr.mxu1 %v225_v14  ;;  %v193_v43 = vld [vmem:[%s687_s27 + $0x80] sm:$0xff]  ;;  %v196_v45 = vld [vmem:[%s687_s27 + $0x98] sm:$0xff]  ;;  %v195_v47 = vld [vmem:[%s687_s27 + $0x90] sm:$0xff] }
  0x1b   : > { %460 = vmatpush3.msra.mxu0 %v209_v15  ;;  %536 = vmatpush3.msra.mxu1 %v209_v15  ;;  %v186_v48 = vld [vmem:[%s687_s27 + $0x48] sm:$0xff]  ;;  %v185_v50 = vld [vmem:[%s687_s27 + $0x40] sm:$0xff]  ;;  %v188_v52 = vld [vmem:[%s687_s27 + $0x58] sm:$0xff] }
  0x1c   : > { %461 = vmatprep.subr.mxu0 %v224_v16  ;;  %521 = vmatprep.subr.mxu1 %v224_v16  ;;  %v198_v49 = vld [vmem:[%s687_s27 + $0xa8] sm:$0xff]  ;;  %v197_v51 = vld [vmem:[%s687_s27 + $0xa0] sm:$0xff]  ;;  %v200_v53 = vld [vmem:[%s687_s27 + $0xb8] sm:$0xff] }
  0x1d   : > { %462 = vmatpush3.msra.mxu0 %v208_v17  ;;  %537 = vmatpush3.msra.mxu1 %v208_v17  ;;  %v187_v54 = vld [vmem:[%s687_s27 + $0x50] sm:$0xff]  ;;  %v441_v58 = vld [vmem:[%s745_s2] ss:$0 sm:$0xff] }
  0x1e   : > { %463 = vmatprep.subr.mxu0 %v223_v18  ;;  %522 = vmatprep.subr.mxu1 %v223_v18  ;;  %v199_v55 = vld [vmem:[%s687_s27 + $0xb0] sm:$0xff] }
  0x1f   : > { %464 = vmatpush3.msra.mxu0 %v207_v19  ;;  %538 = vmatpush3.msra.mxu1 %v207_v19 }
  0x20   : > { %465 = vmatprep.subr.mxu0 %v222_v20  ;;  %523 = vmatprep.subr.mxu1 %v222_v20 }
  0x21   : > { %466 = vmatpush3.msra.mxu0 %v206_v21  ;;  %539 = vmatpush3.msra.mxu1 %v206_v21 }
  0x22   : > { %467 = vmatprep.subr.mxu0 %v221_v22  ;;  %524 = vmatprep.subr.mxu1 %v221_v22 }
  0x23   : > { %468 = vmatpush3.msra.mxu0 %v205_v23  ;;  %540 = vmatpush3.msra.mxu1 %v205_v23 }
  0x24   : > { %469 = vmatprep.subr.mxu0 %v220_v24  ;;  %525 = vmatprep.subr.mxu1 %v220_v24 }
  0x25   : > { %470 = vmatpush3.msra.mxu0 %v204_v25  ;;  %541 = vmatpush3.msra.mxu1 %v204_v25 }
  0x26   : > { %471 = vmatprep.subr.mxu0 %v219_v26  ;;  %526 = vmatprep.subr.mxu1 %v219_v26 }
  0x27   : > { %472 = vmatpush3.msra.mxu0 %v203_v27  ;;  %542 = vmatpush3.msra.mxu1 %v203_v27 }
  0x28   : > { %473 = vmatprep.subr.mxu0 %v218_v28  ;;  %527 = vmatprep.subr.mxu1 %v218_v28 }
  0x29   : > { %474 = vmatpush3.msra.mxu0 %v202_v29  ;;  %543 = vmatpush3.msra.mxu1 %v202_v29 }
  0x2a   : > { %475 = vmatprep.subr.mxu0 %v217_v30  ;;  %528 = vmatprep.subr.mxu1 %v217_v30 }
  0x2b   : > { %476 = vmatpush3.msra.mxu0 %v201_v31  ;;  %544 = vmatpush3.msra.mxu1 %v201_v31 }
  0x2c   : > { %304 = vmatprep.mubr.f32.mxu0 %v178_v32  ;;  %334 = vmatprep.mubr.f32.mxu1 %v190_v33 }
  0x2d   : > { %305 = vmatmul.mubr.f32.vlgmr.msra.gmra.mxu0 %v177_v34  ;;  %335 = vmatmul.mubr.f32.vlgmr.msra.gmra.mxu1 %v189_v35 }
  0x2e   : > { %309 = vmatprep.mubr.f32.mxu0 %v180_v36  ;;  %339 = vmatprep.mubr.f32.mxu1 %v192_v37 }
  0x31   : > { %310 = vmatmul.mubr.f32.gmra.mxu0 %v179_v38  ;;  %340 = vmatmul.mubr.f32.gmra.mxu1 %v191_v39 }
  0x32   : > { %314 = vmatprep.mubr.f32.mxu0 %v182_v40  ;;  %344 = vmatprep.mubr.f32.mxu1 %v194_v41 }
  0x35   : > { %315 = vmatmul.mubr.f32.gmra.mxu0 %v181_v42  ;;  %345 = vmatmul.mubr.f32.gmra.mxu1 %v193_v43 }
  0x36   : > { %319 = vmatprep.mubr.f32.mxu0 %v184_v44  ;;  %349 = vmatprep.mubr.f32.mxu1 %v196_v45 }
  0x39   : > { %320 = vmatmul.mubr.f32.gmra.mxu0 %v183_v46  ;;  %350 = vmatmul.mubr.f32.gmra.mxu1 %v195_v47 }
  0x3a   : > { %324 = vmatprep.mubr.f32.mxu0 %v186_v48  ;;  %354 = vmatprep.mubr.f32.mxu1 %v198_v49 }
  0x3d   : > { %325 = vmatmul.mubr.f32.gmra.mxu0 %v185_v50  ;;  %355 = vmatmul.mubr.f32.gmra.mxu1 %v197_v51 }
  0x3e   : > { %329 = vmatprep.mubr.f32.mxu0 %v188_v52  ;;  %359 = vmatprep.mubr.f32.mxu1 %v200_v53 }
  0x41   : > { %330 = vmatmul.mubr.f32.gmra.mxu0 %v187_v54  ;;  %360 = vmatmul.mubr.f32.gmra.mxu1 %v199_v55 }
  0xed   : > { %v477_v56 = vpop.f32.mrf.mxu0  ;;  %v495_v57 = vpop.f32.mrf.mxu1 }
  0xef   : > { %v478_v59 = vpop.f32.mrf.mxu0  ;;  %v496_v60 = vpop.f32.mrf.mxu1 }
  0xf0   : > { %v479_v61 = vadd.f32 %v478_v59, %v477_v56  ;;  %v497_v62 = vadd.f32 %v496_v60, %v495_v57 }
  0xf1   : > { %v480_v63 = vpop.f32.mrf.mxu0  ;;  %v498_v0 = vpop.f32.mrf.mxu1 }
  0xf2   : > { %v307_v1 = vadd.f32 %v479_v61, %v441_v58  ;;  %v337_v2 = vadd.f32 %v497_v62, %v441_v58 }
  0xf3   : > { %v481_v3 = vpop.f32.mrf.mxu0  ;;  %v499_v4 = vpop.f32.mrf.mxu1 }
  0xf4   : > { %365 = vst [vmem:[%s726_s10] sm:$0xff] %v307_v1  ;;  %371 = vst [vmem:[%s726_s10 + $0x30] sm:$0xff] %v337_v2  ;;  %v482_v5 = vadd.f32 %v481_v3, %v480_v63  ;;  %v500_v6 = vadd.f32 %v499_v4, %v498_v0 }
  0xf5   : > { %v483_v7 = vpop.f32.mrf.mxu0  ;;  %v501_v8 = vpop.f32.mrf.mxu1 }
  0xf6   : > { %v312_v9 = vadd.f32 %v482_v5, %v441_v58  ;;  %v342_v10 = vadd.f32 %v500_v6, %v441_v58 }
  0xf7   : > { %v484_v11 = vpop.f32.mrf.mxu0  ;;  %v502_v12 = vpop.f32.mrf.mxu1 }
  0xf8   : > { %366 = vst [vmem:[%s726_s10 + $0x8] sm:$0xff] %v312_v9  ;;  %372 = vst [vmem:[%s726_s10 + $0x38] sm:$0xff] %v342_v10  ;;  %v485_v13 = vadd.f32 %v484_v11, %v483_v7  ;;  %v503_v14 = vadd.f32 %v502_v12, %v501_v8 }
  0xf9   : > { %v486_v15 = vpop.f32.mrf.mxu0  ;;  %v504_v16 = vpop.f32.mrf.mxu1 }
  0xfa   : > { %v317_v17 = vadd.f32 %v485_v13, %v441_v58  ;;  %v347_v18 = vadd.f32 %v503_v14, %v441_v58 }
  0xfb   : > { %v487_v19 = vpop.f32.mrf.mxu0  ;;  %v505_v20 = vpop.f32.mrf.mxu1 }
  0xfc   : > { %367 = vst [vmem:[%s726_s10 + $0x10] sm:$0xff] %v317_v17  ;;  %373 = vst [vmem:[%s726_s10 + $0x40] sm:$0xff] %v347_v18  ;;  %v488_v21 = vadd.f32 %v487_v19, %v486_v15  ;;  %v506_v22 = vadd.f32 %v505_v20, %v504_v16 }
  0xfd   : > { %v489_v23 = vpop.f32.mrf.mxu0  ;;  %v507_v24 = vpop.f32.mrf.mxu1 }
  0xfe   : > { %v322_v25 = vadd.f32 %v488_v21, %v441_v58  ;;  %v352_v26 = vadd.f32 %v506_v22, %v441_v58 }
  0xff   : > { %v490_v27 = vpop.f32.mrf.mxu0  ;;  %v508_v28 = vpop.f32.mrf.mxu1 }
 0x100   : > { %368 = vst [vmem:[%s726_s10 + $0x18] sm:$0xff] %v322_v25  ;;  %374 = vst [vmem:[%s726_s10 + $0x48] sm:$0xff] %v352_v26  ;;  %v491_v29 = vadd.f32 %v490_v27, %v489_v23  ;;  %v509_v30 = vadd.f32 %v508_v28, %v507_v24 }
 0x101   : > { %v492_v31 = vpop.f32.mrf.mxu0  ;;  %v510_v32 = vpop.f32.mrf.mxu1 }
 0x102   : > { %v327_v33 = vadd.f32 %v491_v29, %v441_v58  ;;  %v357_v34 = vadd.f32 %v509_v30, %v441_v58 }
 0x103   : > { %v493_v35 = vpop.f32.mrf.mxu0  ;;  %v511_v36 = vpop.f32.mrf.mxu1 }
 0x104   : > { %369 = vst [vmem:[%s726_s10 + $0x20] sm:$0xff] %v327_v33  ;;  %375 = vst [vmem:[%s726_s10 + $0x50] sm:$0xff] %v357_v34  ;;  %v494_v37 = vadd.f32 %v493_v35, %v492_v31  ;;  %v512_v38 = vadd.f32 %v511_v36, %v510_v32 }
 0x106   : > { %v332_v39 = vadd.f32 %v494_v37, %v441_v58  ;;  %v362_v40 = vadd.f32 %v512_v38, %v441_v58 }
 0x108   : > { %370 = vst [vmem:[%s726_s10 + $0x28] sm:$0xff] %v332_v39  ;;  %376 = vst [vmem:[%s726_s10 + $0x58] sm:$0xff] %v362_v40 }
 0x109 PF: > { %s13_s12 = sadd.s32 1, %s559_s12  }
 0x10a   : > { %p10_p4 = scmp.ge.s32.totalorder %s13_s12, 4  }
 0x10c   :  { %12 = sbr.rel (!%p10_p4) target bundleno = 1 (0x1), region = 62 }

// kernel: point_pillar_mash_forward.4
= control target key start
LH: loop header
LB: loop body
LE: loop exit
PB: predicated region body
PF: predicated region fallthrough
CT: control target
= control target key end

     0   :  { %s2319_s0 = inlined_call_operand.vmem [shape: s32[3], index: 0, kind: input, shape index: {}]   ;;  %s2320_s4 = inlined_call_operand.vmem [shape: bf16[6,64,32], index: 4, kind: input, shape index: {}]   ;;  %s2321_s5 = inlined_call_operand.vmem [shape: bf16[6,64,32], index: 5, kind: input, shape index: {}]   ;;  %s2322_s6 = inlined_call_operand.vmem [shape: f32[6,64,256], index: 6, kind: input, shape index: {}]   ;;  %s2323_s7 = inlined_call_operand.vmem [shape: f32[6,1,256], index: 7, kind: input, shape index: {}]   ;;  %s2324_s8 = inlined_call_operand.vmem [shape: bf16[80,128], index: 8, kind: input, shape index: {}]   ;;  %s2325_s9 = inlined_call_operand.vmem [shape: f32[1,128], index: 9, kind: input, shape index: {}]   ;;  %s2326_s10 = inlined_call_operand.vmem [shape: f32[3,64,128], index: 10, kind: output, shape index: {0}]   ;;  %s2327_s11 = inlined_call_operand.vmem [shape: f32[3,64,256], index: 11, kind: output, shape index: {1}]   ;;  %s2328_s1 = inlined_call_operand.vmem [shape: s32[3], index: 1, kind: input, shape index: {}]   ;;  %s2329_s2 = inlined_call_operand.vmem [shape: s32[3], index: 2, kind: input, shape index: {}]   ;;  %s2330_s3 = inlined_call_operand.vmem [shape: s32[3], index: 3, kind: input, shape index: {}]  }
   0x1   :  { %s17_s19 = sshll.u32 %s2319_s0, 4  ;;  %s21_s22 = sshll.u32 %s2328_s1, 4  ;;  %s18_s19 = int_to_ptr.vmem [resolvable:$true] %s17_s19  ;;  %s22_s22 = int_to_ptr.vmem [resolvable:$true] %s21_s22 }
   0x2   :  { %s1597_s23 = scalar_lea.vmem %s18_s19, 16  ;;  %p1602_p1 = scmp.lt.s32.totalorder %s18_s19, %s18_s19 }
   0x3   :  { %p1598_p0 = scmp.ne.s32.totalorder %s18_s19, %s1597_s23  ;;  %p1603_p2 = scmp.lt.s32.totalorder %s1597_s23, %s1597_s23 }
   0x5   :  { %p1604_p3 = por %p1603_p2, %p1602_p1 }
   0x7   :  { %p1605_p4 = pnand %p1604_p3, %p1598_p0 }
   0x9   :  { %1608 = shalt.err (!%p1605_p4)  }
   0xa   :  { %s1655_s24 = smov [#allocation3]   ;;  %s1609_s25 = scalar_lea.vmem %s22_s22, 16 }
   0xb   :  { %20 = dma.vmem_to_smem %s18_s19, 16, %s1655_s24, [#allocation2] }
   0xc   :  { %p1610_p5 = scmp.ne.s32.totalorder %s22_s22, %s1609_s25  ;;  %p1614_p6 = scmp.lt.s32.totalorder %s22_s22, %s22_s22 }
   0xd   :  { %p1615_p7 = scmp.lt.s32.totalorder %s1609_s25, %s1609_s25 }
   0xf   :  { %p1616_p8 = por %p1615_p7, %p1614_p6 }
  0x11   :  { %p1617_p9 = pnand %p1616_p8, %p1610_p5 }
  0x13   :  { %1620 = shalt.err (!%p1617_p9)  }
  0x14   :  { %s1656_s0 = smov [#allocation4]   ;;  %s25_s27 = sshll.u32 %s2329_s2, 4  ;;  %s26_s27 = int_to_ptr.vmem [resolvable:$true] %s25_s27 }
  0x15   :  { %24 = dma.vmem_to_smem %s22_s22, 16, %s1656_s0, [#allocation2] }
  0x16   :  { %s29_s30 = sshll.u32 %s2330_s3, 4  ;;  %s1621_s12 = scalar_lea.vmem %s26_s27, 16  ;;  %s30_s30 = int_to_ptr.vmem [resolvable:$true] %s29_s30 }
  0x17   :  { %p1622_p10 = scmp.ne.s32.totalorder %s26_s27, %s1621_s12  ;;  %p1626_p11 = scmp.lt.s32.totalorder %s26_s27, %s26_s27 }
  0x18   :  { %p1627_p12 = scmp.lt.s32.totalorder %s1621_s12, %s1621_s12 }
  0x1a   :  { %p1628_p13 = por %p1627_p12, %p1626_p11 }
  0x1c   :  { %p1629_p0 = pnand %p1628_p13, %p1622_p10 }
  0x1e   :  { %1632 = shalt.err (!%p1629_p0)  }
  0x1f   :  { %s1657_s13 = smov [#allocation5]   ;;  %s1633_s14 = scalar_lea.vmem %s30_s30, 16 }
  0x20   :  { %28 = dma.vmem_to_smem %s26_s27, 16, %s1657_s13, [#allocation2] }
  0x21   :  { %p1634_p1 = scmp.ne.s32.totalorder %s30_s30, %s1633_s14  ;;  %p1638_p2 = scmp.lt.s32.totalorder %s30_s30, %s30_s30 }
  0x22   :  { %p1639_p3 = scmp.lt.s32.totalorder %s1633_s14, %s1633_s14 }
  0x24   :  { %p1640_p4 = por %p1639_p3, %p1638_p2 }
  0x26   :  { %p1641_p5 = pnand %p1640_p4, %p1634_p1 }
  0x28   :  { %1644 = shalt.err (!%p1641_p5)  }
  0x29   :  { %s1658_s2 = smov [#allocation6]  }
  0x2a   :  { %32 = dma.vmem_to_smem %s30_s30, 16, %s1658_s2, [#allocation2] }
  0x2b   :  { %1649 = dma.done.wait [#allocation2], 64 }
  0x2c   :  { %1650 = vsyncadd [#allocation2], 4294967232 }
  0x2d   :  { %34 = sfence }
  0x2e   :  { %s1732_s3 = smov 0  }
  0x2f LB: > { %s1738_s15 = sadd.s32 4294967295, %s1653_s3   ;;  %p1425_p6 = scmp.ge.s32.totalorder %s1653_s3, 1  ;;  %s1653_s3 = sphi %s1732_s3, %s40_s3  }
  0x30   : > { %p309_p7 = scmp.lt.s32.totalorder %s1653_s3, 4 }
  0x32   : > { %p310_p8 = pnand %p1425_p6, %p309_p7 }
  0x33   : > { %s372_s16 = sld [smem:[#allocation4 + %s1738_s15]] (!%p310_p8)  ;;  %p392_p13 = scmp.lt.s32.totalorder (!%p310_p8), %s1738_s15, 2 }
  0x34   : > { %313 = sbr.rel (%p310_p8) target bundleno = 1057 (0x421), region = 44  ;;  %s379_s17 = sld [smem:[#allocation3 + %s1738_s15]] (!%p310_p8) }
  0x35   : > { %s397_s18 = sld [smem:[#allocation5 + %s1738_s15]] (!%p310_p8) }
  0x36   : > { %s365_s19 = sld [smem:[#allocation3 + %s1738_s15]] (!%p310_p8) }
  0x37   : > { %s2136_s13 = sld [smem:[#allocation6 + %s1738_s15]] (!%p310_p8) }
  0x39   : > { %p373_p9 = scmp.lt.s32.totalorder %s372_s16, 5  ;;  %vm477_vm0 = vcmask 261120  }
  0x3a   : > { %p380_p10 = scmp.lt.s32.totalorder %s379_s17, 5 }
  0x3b   : > { %s2336_s16 = smov (!%p373_p9, %s372_s16), 5  ;;  %p398_p11 = scmp.lt.s32.totalorder %s397_s18, 2 }
  0x3c   : > { %s2338_s17 = smov (!%p380_p10, %s379_s17), 5  ;;  %s1472_s20 = sshll.u32 %s2336_s16, 5 }
  0x3d   : > { %s377_s23 = scalar_lea.vmem %s2321_s5, %s1472_s20  ;;  %s1473_s24 = sshll.u32 %s2338_s17, 7 }
  0x3e   : > { %v1749_v0 = vld [vmem:[%s377_s23] sm:$0xff]   ;;  %v1751_v1 = vld [vmem:[%s377_s23 + $0x8] sm:$0xff]   ;;  %v417_v2 = vld [vmem:[%s377_s23 + $0x10] sm:$0xff]   ;;  %s1756_s1 = scalar_lea.vmem %s2322_s6, %s1473_s24  ;;  %p366_p12 = scmp.lt.s32.totalorder %s365_s19, 5 }
  0x3f   : > { %v429_v3 = vunpack.c.l.bf16 %v1749_v0  ;;  %v430_v4 = vunpack.c.h.bf16 %v1749_v0  ;;  %v431_v5 = vunpack.c.l.bf16 %v1751_v1  ;;  %s2340_s18 = smov (!%p398_p11, %s397_s18), 2  ;;  %v432_v6 = vunpack.c.h.bf16 %v1751_v1  ;;  %v419_v12 = vld [vmem:[%s377_s23 + $0x18] sm:$0xff]   ;;  %p1467_p1 = scmp.ne.s32.totalorder %s2136_s13, 1 }
  0x40   : > { %v433_v7 = vunpack.c.l.bf16 %v417_v2  ;;  %v434_v8 = vunpack.c.h.bf16 %v417_v2  ;;  %s2342_s19 = smov (!%p366_p12, %s365_s19), 5  ;;  %s1475_s26 = sshll.u32 %s2340_s18, 7  ;;  %v435_v18 = vunpack.c.l.bf16 %v419_v12  ;;  %1527 = vmatprep.subr.msk.bf16.mxu0 %vm477_vm0, %v419_v12  ;;  %v500_v22 = vsel %vm477_vm0, %v419_v12, 0 }
  0x41   : > { %v599_v9 = vmul.f32 %v429_v3, %v429_v3  ;;  %v600_v10 = vmul.f32 %v430_v4, %v430_v4  ;;  %v601_v11 = vmul.f32 %v431_v5, %v431_v5  ;;  %v602_v13 = vmul.f32 %v432_v6, %v432_v6  ;;  %s1765_s29 = scalar_lea.vmem %s2327_s11, %s1475_s26  ;;  %s1471_s30 = sshll.u32 %s2342_s19, 5  ;;  %1494 = vmatpush3.bf16.xpose.msra.mxu0 %v500_v22  ;;  %v1554_v4 = vld [vmem:[%s2324_s8 + $0x10] sm:$0xff]   ;;  %v1555_v5 = vld [vmem:[%s2324_s8 + $0x8] sm:$0xff]  }
  0x42   : > { %s1772_s14 = scalar_lea.vmem %s2320_s4, %s1471_s30  ;;  %v603_v16 = vmul.f32 %v433_v7, %v433_v7  ;;  %v604_v17 = vmul.f32 %v434_v8, %v434_v8  ;;  %v436_v23 = vunpack.c.h.bf16 %v419_v12  ;;  %1528 = vmatprep.subr.msk.bf16.mxu0 %vm477_vm0, %v417_v2  ;;  %v605_v25 = vmul.f32 %v435_v18, %v435_v18  ;;  %v1556_v7 = vld [vmem:[%s2324_s8] sm:$0xff]  }
  0x43   : > { %v607_v14 = vsel %vm477_vm0, %v599_v9, 0.0  ;;  %v613_v15 = vsel %vm477_vm0, %v601_v11, 0.0  ;;  %v405_v19 = vld [vmem:[%s1772_s14] sm:$0xff]   ;;  %v610_v20 = vsel %vm477_vm0, %v600_v10, 0.0  ;;  %v616_v21 = vsel %vm477_vm0, %v602_v13, 0.0  ;;  %v407_v31 = vld [vmem:[%s1772_s14 + $0x8] sm:$0xff]  }
  0x44   : > { %608 = vadd.xlane.f32.xlu0 %v607_v14  ;;  %614 = vadd.xlane.f32.xlu1 %v613_v15  ;;  %v619_v24 = vsel %vm477_vm0, %v603_v16, 0.0  ;;  %v622_v26 = vsel %vm477_vm0, %v604_v17, 0.0  ;;  %v606_v27 = vmul.f32 %v436_v23, %v436_v23  ;;  %v421_v28 = vunpack.c.l.bf16 %v405_v19  ;;  %v409_v38 = vld [vmem:[%s1772_s14 + $0x10] sm:$0xff]   ;;  %v411_v46 = vld [vmem:[%s1772_s14 + $0x18] sm:$0xff]   ;;  %s393_s25 = scalar_select %p392_p13, %s1738_s15, 2 }
  0x45   : > { %1501 = vmatprep.mubr.msk.bf16.mxu0 %vm477_vm0, %v405_v19  ;;  %v422_v29 = vunpack.c.h.bf16 %v405_v19  ;;  %v497_v30 = vsel %vm477_vm0, %v417_v2, 0  ;;  %v625_v32 = vsel %vm477_vm0, %v605_v25, 0.0  ;;  %v423_v33 = vunpack.c.l.bf16 %v407_v31  ;;  %v1553_v2 = vld [vmem:[%s2324_s8 + $0x18] sm:$0xff]   ;;  %s386_s14 = sld [smem:[#allocation4 + %s1738_s15]] }
  0x46   : > { %v628_v34 = vsel %vm477_vm0, %v606_v27, 0.0  ;;  %v567_v35 = vmul.f32 %v421_v28, %v421_v28  ;;  %v424_v37 = vunpack.c.h.bf16 %v407_v31  ;;  %v425_v39 = vunpack.c.l.bf16 %v409_v38  ;;  %s1474_s0 = sshll.u32 %s393_s25, 6 }
  0x47   : > { %v568_v36 = vmul.f32 %v422_v29, %v422_v29  ;;  %v426_v40 = vunpack.c.h.bf16 %v409_v38  ;;  %v569_v42 = vmul.f32 %v423_v33, %v423_v33  ;;  %v494_v45 = vsel %vm477_vm0, %v1751_v1, 0  ;;  %s396_s12 = scalar_lea.vmem %s2326_s10, %s1474_s0 }
  0x48   : > { %611 = vadd.xlane.f32.xlu0 %v610_v20  ;;  %617 = vadd.xlane.f32.xlu1 %v616_v21  ;;  %v575_v41 = vsel %vm477_vm0, %v567_v35, 0.0  ;;  %v570_v44 = vmul.f32 %v424_v37, %v424_v37  ;;  %v571_v47 = vmul.f32 %v425_v39, %v425_v39  ;;  %v427_v48 = vunpack.c.l.bf16 %v411_v46 }
  0x49   : > { %1496 = vmatpush3.bf16.xpose.msra.mxu0 %v497_v30  ;;  %v578_v43 = vsel %vm477_vm0, %v568_v36, 0.0  ;;  %v581_v49 = vsel %vm477_vm0, %v569_v42, 0.0  ;;  %v572_v51 = vmul.f32 %v426_v40, %v426_v40  ;;  %v428_v52 = vunpack.c.h.bf16 %v411_v46 }
  0x4a   : > { %1529 = vmatprep.subr.msk.bf16.mxu0 %vm477_vm0, %v1751_v1  ;;  %v584_v50 = vsel %vm477_vm0, %v570_v44, 0.0  ;;  %v587_v53 = vsel %vm477_vm0, %v571_v47, 0.0  ;;  %v573_v54 = vmul.f32 %v427_v48, %v427_v48  ;;  %v491_v57 = vsel %vm477_vm0, %v1749_v0, 0 }
  0x4b   : > { %v590_v55 = vsel %vm477_vm0, %v572_v51, 0.0  ;;  %v574_v56 = vmul.f32 %v428_v52, %v428_v52  ;;  %v663_v20 = vlaneseq  ;;  %p387_p0 = scmp.lt.s32.totalorder %s386_s14, 5 }
  0x4c   : > { %620 = vadd.xlane.f32.xlu0 %v619_v24  ;;  %623 = vadd.xlane.f32.xlu1 %v622_v26  ;;  %v593_v58 = vsel %vm477_vm0, %v573_v54, 0.0 }
  0x4d   : > { %v596_v59 = vsel %vm477_vm0, %v574_v56, 0.0  ;;  %v1844_v23 = vshrl.u32 %v663_v20, 7  ;;  %s2344_s14 = smov (!%p387_p0, %s386_s14), 5 }
  0x4e   : > { %s1432_s2 = sshll.u32 %s2344_s14, 1 }
  0x4f   : > { %v665_v27 = vsub.s32 0, %v1844_v23  ;;  %s390_s18 = scalar_lea.vmem %s2323_s7, %s1432_s2 }
  0x50   : > { %626 = vadd.xlane.f32.xlu0 %v625_v32  ;;  %629 = vadd.xlane.f32.xlu1 %v628_v34 }
  0x51   : > { %1498 = vmatpush3.bf16.xpose.msra.mxu0 %v494_v45 }
  0x52   : > { %1530 = vmatprep.subr.msk.bf16.mxu0 %vm477_vm0, %v1749_v0  ;;  %v1552_v0 = vld [vmem:[%s2324_s8 + $0x20] sm:$0xff]  }
  0x53   : > { %1509 = vmatprep.subr.bf16.mxu1 %v1552_v0 }
  0x54   : > { %576 = vadd.xlane.f32.xlu0 %v575_v41  ;;  %579 = vadd.xlane.f32.xlu1 %v578_v43 }
  0x55   : > { %1510 = vmatpush3.bf16.msra.mxu1 %v1552_v0 }
  0x56   : > { %1511 = vmatprep.subr.bf16.mxu1 %v1553_v2 }
  0x58   : > { %582 = vadd.xlane.f32.xlu0 %v581_v49  ;;  %585 = vadd.xlane.f32.xlu1 %v584_v50 }
  0x59   : > { %1500 = vmatpush3.bf16.xpose.msra.mxu0 %v491_v57  ;;  %1512 = vmatpush3.bf16.msra.mxu1 %v1553_v2 }
  0x5a   : > { %1513 = vmatprep.subr.bf16.mxu1 %v1554_v4 }
  0x5c   : > { %588 = vadd.xlane.f32.xlu0 %v587_v53  ;;  %591 = vadd.xlane.f32.xlu1 %v590_v55 }
  0x5d   : > { %1514 = vmatpush3.bf16.msra.mxu1 %v1554_v4 }
  0x5e   : > { %1515 = vmatprep.subr.bf16.mxu1 %v1555_v5 }
  0x60   : > { %594 = vadd.xlane.f32.xlu0 %v593_v58  ;;  %597 = vadd.xlane.f32.xlu1 %v596_v59 }
  0x61   : > { %1502 = vmatmul.mubr.msk.bf16.vlgmr.msra.gmra.mxu0 %vm477_vm0, %v407_v31  ;;  %1516 = vmatpush3.bf16.msra.mxu1 %v1555_v5 }
  0x62   : > { %1505 = vmatprep.mubr.msk.bf16.mxu0 %vm477_vm0, %v409_v38  ;;  %1517 = vmatprep.subr.bf16.mxu1 %v1556_v7 }
  0x65   : > { %1518 = vmatpush3.bf16.msra.mxu1 %v1556_v7 }
  0x69   : > { %1506 = vmatmul.mubr.msk.bf16.gmra.mxu0 %vm477_vm0, %v411_v46 }
  0xcd   : > { %v609_v60 = vpop.xlane.xlu0 %608  ;;  %v615_v62 = vpop.xlane.xlu1 %614 }
  0xce   : > { %631 = vxpose.xlu0.b32.start [1/8] (short) (narrow) %v609_v60, 8 }
  0xd1   : > { %v612_v61 = vpop.xlane.xlu0 %611  ;;  %v618_v63 = vpop.xlane.xlu1 %617 }
  0xd2   : > { %632 = vxpose.xlu0.b32.cont [2/8] (short) (narrow) %v612_v61, 8 }
  0xd5   : > { %v621_v1 = vpop.xlane.xlu0 %620  ;;  %v624_v3 = vpop.xlane.xlu1 %623 }
  0xd6   : > { %633 = vxpose.xlu0.b32.cont [3/8] (short) (narrow) %v615_v62, 8 }
  0xd9   : > { %v627_v6 = vpop.xlane.xlu0 %626  ;;  %v630_v8 = vpop.xlane.xlu1 %629 }
  0xda   : > { %634 = vxpose.xlu0.b32.cont [4/8] (short) (narrow) %v618_v63, 8 }
  0xdd   : > { %v1823_v10 = vpop.xlane.xlu0 %576  ;;  %v1825_v12 = vpop.xlane.xlu1 %579 }
  0xde   : > { %635 = vxpose.xlu0.b32.cont [5/8] (short) (narrow) %v621_v1, 8  ;;  %1565 = vrsqrt.f32 %v1823_v10  ;;  %vm765_vm1 = vcmp.eq.f32.partialorder %v1823_v10, inf  ;;  %v768_v31 = vand.u32 2147483648, %v1823_v10  ;;  %v775_v32 = vand.u32 2147483648, %v1825_v12 }
  0xdf   : > { %1567 = vrsqrt.f32 %v1825_v12  ;;  %vm772_vm4 = vcmp.eq.f32.partialorder %v1825_v12, inf  ;;  %vm767_vm9 = vcmp.eq.f32.partialorder %v1823_v10, 0.0  ;;  %vm774_vm10 = vcmp.eq.f32.partialorder %v1825_v12, 0.0 }
  0xe1   : > { %v1827_v14 = vpop.xlane.xlu0 %582  ;;  %v1830_v16 = vpop.xlane.xlu1 %585 }
  0xe2   : > { %636 = vxpose.xlu0.b32.cont [6/8] (short) (narrow) %v624_v3, 8  ;;  %1569 = vrsqrt.f32 %v1827_v14  ;;  %v782_v29 = vand.u32 2147483648, %v1827_v14  ;;  %vm779_vm2 = vcmp.eq.f32.partialorder %v1827_v14, inf  ;;  %vm786_vm3 = vcmp.eq.f32.partialorder %v1830_v16, inf }
  0xe3   : > { %1571 = vrsqrt.f32 %v1830_v16  ;;  %v789_v34 = vand.u32 2147483648, %v1830_v16  ;;  %vm781_vm7 = vcmp.eq.f32.partialorder %v1827_v14, 0.0  ;;  %vm788_vm8 = vcmp.eq.f32.partialorder %v1830_v16, 0.0 }
  0xe5   : > { %v1833_v17 = vpop.xlane.xlu0 %588  ;;  %v1835_v19 = vpop.xlane.xlu1 %591 }
  0xe6   : > { %637 = vxpose.xlu0.b32.cont [7/8] (short) (narrow) %v627_v6, 8  ;;  %1573 = vrsqrt.f32 %v1833_v17  ;;  %v796_v33 = vand.u32 2147483648, %v1833_v17  ;;  %v803_v35 = vand.u32 2147483648, %v1835_v19  ;;  %vm793_vm5 = vcmp.eq.f32.partialorder %v1833_v17, inf }
  0xe7   : > { %1575 = vrsqrt.f32 %v1835_v19  ;;  %vm800_vm6 = vcmp.eq.f32.partialorder %v1835_v19, inf  ;;  %vm795_vm11 = vcmp.eq.f32.partialorder %v1833_v17, 0.0  ;;  %vm802_vm13 = vcmp.eq.f32.partialorder %v1835_v19, 0.0 }
  0xe9   : > { %v1840_v22 = vpop.xlane.xlu0 %594  ;;  %v1846_v24 = vpop.xlane.xlu1 %597 }
  0xea   : > { %638 = vxpose.xlu0.b32.end [8/8] (short) (narrow) %v630_v8, 8  ;;  %1577 = vrsqrt.f32 %v1840_v22  ;;  %vm807_vm12 = vcmp.eq.f32.partialorder %v1840_v22, inf  ;;  %vm809_vm14 = vcmp.eq.f32.partialorder %v1840_v22, 0.0  ;;  %vm814_vm15 = vcmp.eq.f32.partialorder %v1846_v24, inf }
  0xeb   : > { %v1566_v26 = vpop.eup %1565  ;;  %1579 = vrsqrt.f32 %v1846_v24  ;;  %vm816_vm0 = vcmp.eq.f32.partialorder %v1846_v24, 0.0 }
  0xec   : > { %v1568_v28 = vpop.eup %1567  ;;  %v764_v37 = vmul.f32 %v1566_v26, %v1823_v10 }
  0xed   : > { %v771_v41 = vmul.f32 %v1568_v28, %v1825_v12 }
  0xef   : > { %v1570_v42 = vpop.eup %1569 }
  0xf0   : > { %v1572_v47 = vpop.eup %1571  ;;  %v778_v2 = vmul.f32 %v1570_v42, %v1827_v14 }
  0xf1   : > { %v785_v4 = vmul.f32 %v1572_v47, %v1830_v16 }
  0xf2   : > { %v780_v28 = vsel %vm779_vm2, %v1827_v14, %v778_v2  ;;  %vm836_vm2 = vcmask 531456  }
  0xf3   : > { %v1574_v52 = vpop.eup %1573  ;;  %v1948_v47 = vsel %vm781_vm7, %v782_v29, %v780_v28 }
  0xf4   : > { %v1576_v61 = vpop.eup %1575  ;;  %v792_v3 = vmul.f32 %v1574_v52, %v1833_v17 }
 0x121   : > { %v1503_v9 = vpop.f32.mrf.mxu0 }
 0x122   : > { %v677_v38 = vmul.f32 2.0, %v1503_v9 }
 0x123   : > { %v536_v11 = vpop.f32.mrf.mxu0 }
 0x124   : > { %v675_v39 = vmul.f32 2.0, %v536_v11  ;;  %v1578_v11 = vpop.eup %1577 }
 0x125   : > { %v1504_v13 = vpop.f32.mrf.mxu0 }
 0x126   : > { %v678_v43 = vmul.f32 2.0, %v1504_v13  ;;  %v799_v13 = vmul.f32 %v1576_v61, %v1835_v19 }
 0x127   : > { %v539_v15 = vpop.f32.mrf.mxu0 }
 0x128   : > { %v676_v44 = vmul.f32 2.0, %v539_v15 }
 0x129   : > { %v1507_v18 = vpop.f32.mrf.mxu0 }
 0x12a   : > { %v681_v48 = vmul.f32 2.0, %v1507_v18 }
 0x12b   : > { %v552_v21 = vpop.f32.mrf.mxu0 }
 0x12c   : > { %v679_v45 = vmul.f32 2.0, %v552_v21  ;;  %v1580_v21 = vpop.eup %1579 }
 0x12d   : > { %v1508_v25 = vpop.f32.mrf.mxu0 }
 0x12e   : > { %v682_v57 = vmul.f32 2.0, %v1508_v25  ;;  %v766_v25 = vsel %vm765_vm1, %v1823_v10, %v764_v37  ;;  %v794_v37 = vsel %vm793_vm5, %v1833_v17, %v792_v3  ;;  %vm827_vm1 = vcmask 523264  }
 0x12f   : > { %v555_v30 = vpop.f32.mrf.mxu0 }
 0x130   : > { %v680_v46 = vmul.f32 2.0, %v555_v30  ;;  %v787_v30 = vsel %vm786_vm3, %v1830_v16, %v785_v4 }
 0x14a   : > { %v647_v36 = vpop.trf.xlu0 }
 0x14b   : > { %v666_v40 = vrot.slane %v647_v36, %v665_v27  ;;  %v773_v36 = vsel %vm772_vm4, %v1825_v12, %v771_v41  ;;  %v810_v41 = vand.u32 2147483648, %v1840_v22 }
 0x14d   : > { %v669_v49 = vadd.f32 %v666_v40, %v1827_v14  ;;  %v670_v50 = vadd.f32 %v666_v40, %v1830_v16  ;;  %v671_v51 = vadd.f32 %v666_v40, %v1833_v17  ;;  %v673_v53 = vadd.f32 %v666_v40, %v1840_v22 }
 0x14e   : > { %v672_v54 = vadd.f32 %v666_v40, %v1835_v19  ;;  %v667_v55 = vadd.f32 %v666_v40, %v1823_v10  ;;  %v668_v56 = vadd.f32 %v666_v40, %v1825_v12  ;;  %v674_v60 = vadd.f32 %v666_v40, %v1846_v24 }
 0x14f   : > { %v685_v58 = vsub.f32 %v669_v49, %v677_v38  ;;  %v686_v59 = vsub.f32 %v670_v50, %v678_v43  ;;  %v687_v62 = vsub.f32 %v671_v51, %v679_v45  ;;  %v689_v6 = vsub.f32 %v673_v53, %v681_v48 }
 0x150   : > { %v688_v63 = vsub.f32 %v672_v54, %v680_v46  ;;  %v683_v0 = vsub.f32 %v667_v55, %v675_v39  ;;  %v684_v1 = vsub.f32 %v668_v56, %v676_v44  ;;  %v690_v15 = vsub.f32 %v674_v60, %v682_v57 }
 0x151   : > { %v1885_v5 = vmax.f32 %v685_v58, 0.0  ;;  %v1894_v18 = vmax.f32 %v686_v59, 0.0  ;;  %v1902_v26 = vmax.f32 %v687_v62, 0.0  ;;  %v806_v38 = vmul.f32 %v1578_v11, %v1840_v22 }
 0x152   : > { %v1887_v7 = vmax.f32 %v688_v63, 0.0  ;;  %v1889_v8 = vmax.f32 %v683_v0, 0.0  ;;  %v1891_v9 = vmax.f32 %v684_v1, 0.0  ;;  %v1919_v39 = vmax.f32 %v689_v6, 0.0 }
 0x153   : > { %1581 = vrsqrt.f32 %v1885_v5  ;;  %v801_v40 = vsel %vm800_vm6, %v1835_v19, %v799_v13  ;;  %v1924_v42 = vmax.f32 %v690_v15, 0.0  ;;  %v813_v43 = vmul.f32 %v1580_v21, %v1846_v24 }
 0x154   : > { %1583 = vrsqrt.f32 %v1887_v7  ;;  %v817_v44 = vand.u32 2147483648, %v1846_v24  ;;  %v1936_v45 = vsel %vm767_vm9, %v768_v31, %v766_v25  ;;  %v1942_v46 = vsel %vm774_vm10, %v775_v32, %v773_v36 }
 0x155   : > { %1585 = vrsqrt.f32 %v1889_v8  ;;  %v1954_v48 = vsel %vm788_vm8, %v789_v34, %v787_v30  ;;  %v808_v10 = vsel %vm807_vm12, %v1840_v22, %v806_v38  ;;  %v1963_v12 = vsel %vm795_vm11, %v796_v33, %v794_v37 }
 0x156   : > { %1587 = vrsqrt.f32 %v1891_v9  ;;  %v1969_v14 = vsel %vm802_vm13, %v803_v35, %v801_v40  ;;  %v815_v16 = vsel %vm814_vm15, %v1846_v24, %v813_v43  ;;  %v819_v29 = vsub.f32 0.0, %v1936_v45 }
 0x157   : > { %1589 = vrsqrt.f32 %v1894_v18  ;;  %v820_v17 = vsub.f32 0.0, %v1942_v46  ;;  %v821_v31 = vsub.f32 0.0, %v1948_v47  ;;  %v822_v19 = vsub.f32 0.0, %v1954_v48 }
 0x158   : > { %1591 = vrsqrt.f32 %v1902_v26  ;;  %v823_v32 = vsub.f32 0.0, %v1963_v12  ;;  %v824_v33 = vsub.f32 0.0, %v1969_v14  ;;  %v1983_v34 = vsel %vm809_vm14, %v810_v41, %v808_v10 }
 0x159   : > { %1593 = vrsqrt.f32 %v1919_v39  ;;  %vm715_vm3 = vcmp.eq.f32.partialorder %v1885_v5, inf  ;;  %vm717_vm4 = vcmp.eq.f32.partialorder %v1885_v5, 0.0  ;;  %v718_v24 = vand.u32 2147483648, %v1885_v5 }
 0x15a   : > { %1595 = vrsqrt.f32 %v1924_v42  ;;  %v1988_v35 = vsel %vm816_vm0, %v817_v44, %v815_v16  ;;  %vm701_vm5 = vcmp.eq.f32.partialorder %v1889_v8, inf  ;;  %vm703_vm6 = vcmp.eq.f32.partialorder %v1889_v8, 0.0 }
 0x15b   : > { %v704_v49 = vand.u32 2147483648, %v1889_v8  ;;  %vm708_vm7 = vcmp.eq.f32.partialorder %v1891_v9, inf  ;;  %vm710_vm8 = vcmp.eq.f32.partialorder %v1891_v9, 0.0  ;;  %v711_v22 = vand.u32 2147483648, %v1891_v9 }
 0x15c   : > { %vm722_vm9 = vcmp.eq.f32.partialorder %v1894_v18, inf  ;;  %vm724_vm10 = vcmp.eq.f32.partialorder %v1894_v18, 0.0  ;;  %v725_v53 = vand.u32 2147483648, %v1894_v18  ;;  %vm729_vm11 = vcmp.eq.f32.partialorder %v1902_v26, inf }
 0x15d   : > { %vm731_vm12 = vcmp.eq.f32.partialorder %v1902_v26, 0.0  ;;  %v732_v56 = vand.u32 2147483648, %v1902_v26  ;;  %vm736_vm13 = vcmp.eq.f32.partialorder %v1887_v7, inf  ;;  %vm738_vm14 = vcmp.eq.f32.partialorder %v1887_v7, 0.0 }
 0x15e   : > { %v739_v60 = vand.u32 2147483648, %v1887_v7  ;;  %v746_v61 = vand.u32 2147483648, %v1919_v39  ;;  %vm743_vm0 = vcmp.eq.f32.partialorder %v1919_v39, inf  ;;  %vm750_vm15 = vcmp.eq.f32.partialorder %v1924_v42, inf }
 0x160   : > { %v1582_v50 = vpop.eup %1581 }
 0x161   : > { %v1584_v51 = vpop.eup %1583  ;;  %v714_v52 = vmul.f32 %v1582_v50, %v1885_v5 }
 0x162   : > { %v1586_v54 = vpop.eup %1585  ;;  %v735_v55 = vmul.f32 %v1584_v51, %v1887_v7 }
 0x163   : > { %v1588_v57 = vpop.eup %1587  ;;  %v700_v58 = vmul.f32 %v1586_v54, %v1889_v8  ;;  %v716_v59 = vsel %vm715_vm3, %v1885_v5, %v714_v52  ;;  %vm745_vm3 = vcmp.eq.f32.partialorder %v1919_v39, 0.0  ;;  %v826_v54 = vsub.f32 0.0, %v1988_v35 }
 0x164   : > { %v1590_v62 = vpop.eup %1589  ;;  %v707_v63 = vmul.f32 %v1588_v57, %v1891_v9  ;;  %v719_v0 = vsel %vm717_vm4, %v718_v24, %v716_v59  ;;  %v737_v1 = vsel %vm736_vm13, %v1887_v7, %v735_v55  ;;  %vm752_vm4 = vcmp.eq.f32.partialorder %v1924_v42, 0.0 }
 0x165   : > { %v1592_v2 = vpop.eup %1591  ;;  %v702_v3 = vsel %vm701_vm5, %v1889_v8, %v700_v58  ;;  %v721_v4 = vmul.f32 %v1590_v62, %v1894_v18  ;;  %v757_v6 = vsub.f32 0.0, %v719_v0  ;;  %v740_v11 = vsel %vm738_vm14, %v739_v60, %v737_v1 }
 0x166   : > { %v705_v5 = vsel %vm703_vm6, %v704_v49, %v702_v3  ;;  %v709_v13 = vsel %vm708_vm7, %v1891_v9, %v707_v63  ;;  %v728_v15 = vmul.f32 %v1592_v2, %v1902_v26  ;;  %v760_v21 = vsub.f32 0.0, %v740_v11  ;;  %v1594_v25 = vpop.eup %1593 }
 0x167   : > { %v712_v28 = vsel %vm710_vm8, %v711_v22, %v709_v13  ;;  %v755_v7 = vsub.f32 0.0, %v705_v5  ;;  %v723_v30 = vsel %vm722_vm9, %v1894_v18, %v721_v4  ;;  %v830_v36 = vsel %vm827_vm1, %v757_v6, %v821_v31  ;;  %v1596_v8 = vpop.eup %1595 }
 0x168   : > { %v756_v37 = vsub.f32 0.0, %v712_v28  ;;  %v726_v38 = vsel %vm724_vm10, %v725_v53, %v723_v30  ;;  %v839_v40 = vsel %vm836_vm2, %v830_v36, 0.0  ;;  %v730_v43 = vsel %vm729_vm11, %v1902_v26, %v728_v15 }
 0x169   : > { %v828_v9 = vsel %vm827_vm1, %v755_v7, %v819_v29  ;;  %v758_v41 = vsub.f32 0.0, %v726_v38  ;;  %v733_v44 = vsel %vm731_vm12, %v732_v56, %v730_v43  ;;  %v833_v47 = vsel %vm827_vm1, %v760_v21, %v824_v33 }
 0x16a   : > { %v829_v18 = vsel %vm827_vm1, %v756_v37, %v820_v17  ;;  %v837_v10 = vsel %vm836_vm2, %v828_v9, 0.0  ;;  %v759_v14 = vsub.f32 0.0, %v733_v44  ;;  %v842_v16 = vsel %vm836_vm2, %v833_v47, 0.0 }
 0x16b   : > { %v838_v31 = vsel %vm836_vm2, %v829_v18, 0.0  ;;  %v831_v45 = vsel %vm827_vm1, %v758_v41, %v822_v19  ;;  %v742_v26 = vmul.f32 %v1594_v25, %v1919_v39  ;;  %v749_v29 = vmul.f32 %v1596_v8, %v1924_v42 }
 0x16c   : > { %v845_v33 = vpack.c.bf16 %v838_v31, %v837_v10  ;;  %v840_v46 = vsel %vm836_vm2, %v831_v45, 0.0  ;;  %v832_v17 = vsel %vm827_vm1, %v759_v14, %v823_v32  ;;  %v753_v24 = vand.u32 2147483648, %v1924_v42 }
 0x16d   : > { %v846_v49 = vpack.c.bf16 %v840_v46, %v839_v40  ;;  %v841_v50 = vsel %vm836_vm2, %v832_v17, 0.0  ;;  %v744_v48 = vsel %vm743_vm0, %v1919_v39, %v742_v26  ;;  %v751_v19 = vsel %vm750_vm15, %v1924_v42, %v749_v29 }
 0x16e   : > { %vm2331_vm5 = vcmask 654336   ;;  %v847_v22 = vpack.c.bf16 %v842_v16, %v841_v50  ;;  %v747_v12 = vsel %vm745_vm3, %v746_v61, %v744_v48  ;;  %v754_v32 = vsel %vm752_vm4, %v753_v24, %v751_v19 }
 0x16f   : > { %1519 = vmatprep.mubr.msk.bf16.mxu1 %vm2331_vm5, %v845_v33  ;;  %vm2332_vm6 = vmmov %vm2331_vm5  ;;  %v761_v51 = vsub.f32 0.0, %v747_v12  ;;  %v762_v52 = vsub.f32 0.0, %v754_v32  ;;  %v825_v53 = vsub.f32 0.0, %v1983_v34  ;;  %v1449_v34 = vld [vmem:[%s2325_s9] ss:$0 sm:$0xff]  ;;  %v999_v15 = vand.u32 127, %v663_v20 }
 0x170   : > { %1520 = vmatmul.mubr.msk.bf16.vlgmr.msra.gmra.mxu1 %vm2332_vm6, %v846_v49  ;;  %vm2333_vm7 = vmmov %vm2331_vm5 }
 0x171   : > { %1523 = vmatprep.mubr.msk.bf16.mxu1 %vm2333_vm7, %v847_v22  ;;  %v834_v55 = vsel %vm827_vm1, %v761_v51, %v825_v53  ;;  %v835_v56 = vsel %vm827_vm1, %v762_v52, %v826_v54  ;;  %vm2334_vm8 = vmmov %vm2331_vm5 }
 0x172   : > { %v843_v39 = vsel %vm836_vm2, %v834_v55, 0.0  ;;  %v844_v57 = vsel %vm836_vm2, %v835_v56, 0.0 }
 0x173   : > { %v848_v42 = vpack.c.bf16 %v844_v57, %v843_v39 }
 0x178   : > { %1524 = vmatmul.mubr.msk.bf16.gmra.mxu1 %vm2334_vm8, %v848_v42 }
 0x230   : > { %v1521_v35 = vpop.f32.mrf.mxu1 }
 0x231   : > { %v952_v58 = vadd.f32 %v1521_v35, %v1449_v34 }
 0x232   : > { %v943_v59 = vpop.f32.mrf.mxu1 }
 0x233   : > { %976 = vst [vmem:[%s396_s12 + $0x10] sm:$0xff] %v952_v58  ;;  %v944_v60 = vadd.f32 %v1449_v34, %v943_v59  ;;  %986 = vmax.xlane.f32.xlu1 %v952_v58 }
 0x234   : > { %v1522_v61 = vpop.f32.mrf.mxu1 }
 0x235   : > { %974 = vst [vmem:[%s396_s12] sm:$0xff] %v944_v60  ;;  %v955_v62 = vadd.f32 %v1522_v61, %v1449_v34 }
 0x236   : > { %v946_v63 = vpop.f32.mrf.mxu1 }
 0x237   : > { %977 = vst [vmem:[%s396_s12 + $0x18] sm:$0xff] %v955_v62  ;;  %v947_v0 = vadd.f32 %v1449_v34, %v946_v63  ;;  %982 = vmax.xlane.f32.xlu1 %v944_v60 }
 0x238   : > { %v1525_v1 = vpop.f32.mrf.mxu1 }
 0x239   : > { %975 = vst [vmem:[%s396_s12 + $0x8] sm:$0xff] %v947_v0  ;;  %v968_v2 = vadd.f32 %v1525_v1, %v1449_v34 }
 0x23a   : > { %v959_v3 = vpop.f32.mrf.mxu1 }
 0x23b   : > { %980 = vst [vmem:[%s396_s12 + $0x30] sm:$0xff] %v968_v2  ;;  %v960_v4 = vadd.f32 %v1449_v34, %v959_v3  ;;  %988 = vmax.xlane.f32.xlu1 %v955_v62 }
 0x23c   : > { %v1526_v6 = vpop.f32.mrf.mxu1 }
 0x23d   : > { %978 = vst [vmem:[%s396_s12 + $0x20] sm:$0xff] %v960_v4  ;;  %v971_v11 = vadd.f32 %v1526_v6, %v1449_v34 }
 0x23e   : > { %v962_v5 = vpop.f32.mrf.mxu1 }
 0x23f   : > { %981 = vst [vmem:[%s396_s12 + $0x38] sm:$0xff] %v971_v11  ;;  %v963_v13 = vadd.f32 %v1449_v34, %v962_v5  ;;  %984 = vmax.xlane.f32.xlu1 %v947_v0 }
 0x241   : > { %979 = vst [vmem:[%s396_s12 + $0x28] sm:$0xff] %v963_v13 }
 0x243   : > { %994 = vmax.xlane.f32.xlu1 %v968_v2 }
 0x247   : > { %990 = vmax.xlane.f32.xlu1 %v960_v4 }
 0x24b   : > { %992 = vmax.xlane.f32.xlu1 %v963_v13 }
 0x24f   : > { %996 = vmax.xlane.f32.xlu1 %v971_v11 }
 0x2bc   : > { %v2096_v21 = vpop.xlane.xlu1 %986 }
 0x2bd   : > { %vm1002_vm1 = vcmp.eq.f32.partialorder %v952_v58, %v2096_v21 }
 0x2be   : > { %v1010_v25 = vsel %vm1002_vm1, %v999_v15, 128 }
 0x2bf   : > { %v1045_v28 = vshra.s32 %v1010_v25, 16  ;;  %v1044_v22 = vand.u32 65535, %v1010_v25 }
 0x2c0   : > { %v2099_v7 = vpop.xlane.xlu1 %982 }
 0x2c1   : > { %vm1000_vm2 = vcmp.eq.f32.partialorder %v944_v60, %v2099_v7  ;;  %v1047_v30 = vcvt.s32.f32 %v1045_v28  ;;  %v1046_v32 = vcvt.s32.f32 %v1044_v22 }
 0x2c2   : > { %v1008_v36 = vsel %vm1000_vm2, %v999_v15, 128 }
 0x2c3   : > { %1048 = vmin.xlane.f32.xlu1 %v1047_v30  ;;  %v1017_v8 = vshra.s32 %v1008_v36, 16  ;;  %v1016_v51 = vand.u32 65535, %v1008_v36 }
 0x2c4   : > { %v2102_v37 = vpop.xlane.xlu1 %988 }
 0x2c5   : > { %vm1003_vm9 = vcmp.eq.f32.partialorder %v955_v62, %v2102_v37  ;;  %v1019_v38 = vcvt.s32.f32 %v1017_v8  ;;  %v1018_v54 = vcvt.s32.f32 %v1016_v51  ;;  %v1160_v8 = vld [vmem:[%s390_s18] sm:$0x3] }
 0x2c6   : > { %v1011_v20 = vsel %vm1003_vm9, %v999_v15, 128 }
 0x2c7   : > { %1020 = vmin.xlane.f32.xlu1 %v1019_v38  ;;  %v1059_v40 = vshra.s32 %v1011_v20, 16  ;;  %v1058_v55 = vand.u32 65535, %v1011_v20 }
 0x2c8   : > { %v2105_v43 = vpop.xlane.xlu1 %984 }
 0x2c9   : > { %vm1001_vm10 = vcmp.eq.f32.partialorder %v947_v0, %v2105_v43  ;;  %v1061_v9 = vcvt.s32.f32 %v1059_v40  ;;  %v1060_v57 = vcvt.s32.f32 %v1058_v55 }
 0x2ca   : > { %v1009_v41 = vsel %vm1001_vm10, %v999_v15, 128 }
 0x2cb   : > { %1062 = vmin.xlane.f32.xlu1 %v1061_v9  ;;  %v1031_v44 = vshra.s32 %v1009_v41, 16  ;;  %v1030_v42 = vand.u32 65535, %v1009_v41 }
 0x2cc   : > { %v2108_v47 = vpop.xlane.xlu1 %994 }
 0x2cd   : > { %vm1006_vm11 = vcmp.eq.f32.partialorder %v968_v2, %v2108_v47  ;;  %v1033_v18 = vcvt.s32.f32 %v1031_v44  ;;  %v1032_v58 = vcvt.s32.f32 %v1030_v42  ;;  %v2145_v44 = vrot.slane %v1160_v8, %v665_v27 }
 0x2ce   : > { %v1014_v10 = vsel %vm1006_vm11, %v999_v15, 128 }
 0x2cf   : > { %1034 = vmin.xlane.f32.xlu1 %v1033_v18  ;;  %v1101_v14 = vshra.s32 %v1014_v10, 16  ;;  %v1100_v59 = vand.u32 65535, %v1014_v10 }
 0x2d0   : > { %v2111_v16 = vpop.xlane.xlu1 %990 }
 0x2d1   : > { %vm1004_vm12 = vcmp.eq.f32.partialorder %v960_v4, %v2111_v16  ;;  %v1103_v31 = vcvt.s32.f32 %v1101_v14  ;;  %v1102_v62 = vcvt.s32.f32 %v1100_v59 }
 0x2d2   : > { %v1012_v45 = vsel %vm1004_vm12, %v999_v15, 128 }
 0x2d3   : > { %1104 = vmin.xlane.f32.xlu1 %v1103_v31  ;;  %v1073_v26 = vshra.s32 %v1012_v45, 16  ;;  %v1072_v63 = vand.u32 65535, %v1012_v45 }
 0x2d4   : > { %v2114_v29 = vpop.xlane.xlu1 %992 }
 0x2d5   : > { %vm1005_vm13 = vcmp.eq.f32.partialorder %v963_v13, %v2114_v29  ;;  %v1075_v33 = vcvt.s32.f32 %v1073_v26  ;;  %v1074_v2 = vcvt.s32.f32 %v1072_v63  ;;  %v1659_v26 = vmov 0.0  }
 0x2d6   : > { %v1013_v46 = vsel %vm1005_vm13, %v999_v15, 128 }
 0x2d7   : > { %1076 = vmin.xlane.f32.xlu1 %v1075_v33  ;;  %v1087_v17 = vshra.s32 %v1013_v46, 16  ;;  %v1086_v3 = vand.u32 65535, %v1013_v46 }
 0x2d8   : > { %v2117_v24 = vpop.xlane.xlu1 %996 }
 0x2d9   : > { %vm1007_vm14 = vcmp.eq.f32.partialorder %v971_v11, %v2117_v24  ;;  %v1089_v49 = vcvt.s32.f32 %v1087_v17  ;;  %v1088_v11 = vcvt.s32.f32 %v1086_v3 }
 0x2da   : > { %v1015_v50 = vsel %vm1007_vm14, %v999_v15, 128 }
 0x2db   : > { %1090 = vmin.xlane.f32.xlu1 %v1089_v49  ;;  %v1115_v48 = vshra.s32 %v1015_v50, 16  ;;  %v1114_v5 = vand.u32 65535, %v1015_v50 }
 0x2dd   : > { %v1117_v19 = vcvt.s32.f32 %v1115_v48  ;;  %v1116_v25 = vcvt.s32.f32 %v1114_v5 }
 0x2df   : > { %1118 = vmin.xlane.f32.xlu1 %v1117_v19 }
 0x34c   : > { %v1049_v12 = vpop.xlane.xlu1 %1048 }
 0x34d   : > { %vm1050_vm15 = vcmp.eq.f32.partialorder %v1047_v30, %v1049_v12  ;;  %v1055_v30 = vcvt.f32.s32 %v1049_v12 }
 0x34e   : > { %v1051_v52 = vsel %vm1050_vm15, %v1046_v32, inf }
 0x34f   : > { %1052 = vmin.xlane.f32.xlu1 %v1051_v52  ;;  %v1056_v20 = vshll.u32 %v1055_v30, 16 }
 0x350   : > { %v1021_v53 = vpop.xlane.xlu1 %1020 }
 0x351   : > { %vm1022_vm0 = vcmp.eq.f32.partialorder %v1019_v38, %v1021_v53  ;;  %v1168_v38 = vsub.s32 1, %v1844_v23  ;;  %v1027_v40 = vcvt.f32.s32 %v1021_v53 }
 0x352   : > { %v1023_v56 = vsel %vm1022_vm0, %v1018_v54, inf }
 0x353   : > { %1024 = vmin.xlane.f32.xlu1 %v1023_v56  ;;  %v2147_v14 = vrot.slane %v1160_v8, %v1168_v38 }
 0x354   : > { %v1063_v39 = vpop.xlane.xlu1 %1062 }
 0x355   : > { %vm1064_vm3 = vcmp.eq.f32.partialorder %v1061_v9, %v1063_v39 }
 0x356   : > { %v1065_v34 = vsel %vm1064_vm3, %v1060_v57, inf }
 0x357   : > { %1066 = vmin.xlane.f32.xlu0 %v1065_v34 }
 0x358   : > { %v2120_v35 = vpop.xlane.xlu1 %1034 }
 0x359   : > { %vm1036_vm4 = vcmp.eq.f32.partialorder %v1033_v18, %v2120_v35  ;;  %v1069_v18 = vcvt.f32.s32 %v1063_v39  ;;  %v1041_v50 = vcvt.f32.s32 %v2120_v35 }
 0x35a   : > { %v1037_v60 = vsel %vm1036_vm4, %v1032_v58, inf }
 0x35b   : > { %1038 = vmin.xlane.f32.xlu1 %v1037_v60  ;;  %v1042_v51 = vshll.u32 %v1041_v50, 16 }
 0x35c   : > { %v2123_v61 = vpop.xlane.xlu1 %1104 }
 0x35d   : > { %vm1106_vm5 = vcmp.eq.f32.partialorder %v1103_v31, %v2123_v61  ;;  %v1028_v31 = vshll.u32 %v1027_v40, 16 }
 0x35e   : > { %v1107_v0 = vsel %vm1106_vm5, %v1102_v62, inf }
 0x35f   : > { %1108 = vmin.xlane.f32.xlu1 %v1107_v0 }
 0x360   : > { %v2126_v1 = vpop.xlane.xlu1 %1076 }
 0x361   : > { %vm1078_vm6 = vcmp.eq.f32.partialorder %v1075_v33, %v2126_v1 }
 0x362   : > { %v1079_v4 = vsel %vm1078_vm6, %v1074_v2, inf }
 0x363   : > { %1080 = vmin.xlane.f32.xlu1 %v1079_v4 }
 0x364   : > { %v2129_v6 = vpop.xlane.xlu1 %1090 }
 0x365   : > { %vm1092_vm7 = vcmp.eq.f32.partialorder %v1089_v49, %v2129_v6  ;;  %v1070_v49 = vshll.u32 %v1069_v18, 16 }
 0x366   : > { %v1093_v13 = vsel %vm1092_vm7, %v1088_v11, inf }
 0x367   : > { %1094 = vmin.xlane.f32.xlu1 %v1093_v13 }
 0x368   : > { %v2132_v15 = vpop.xlane.xlu1 %1118 }
 0x369   : > { %vm1120_vm8 = vcmp.eq.f32.partialorder %v1117_v19, %v2132_v15 }
 0x36a   : > { %v1121_v28 = vsel %vm1120_vm8, %v1116_v25, inf }
 0x36b   : > { %1122 = vmin.xlane.f32.xlu1 %v1121_v28 }
 0x3d8   : > { %v1053_v36 = vpop.xlane.xlu1 %1052 }
 0x3d9   : > { %v1054_v9 = vcvt.f32.s32 %v1053_v36 }
 0x3db   : > { %v1057_v41 = vadd.s32 %v1056_v20, %v1054_v9 }
 0x3dc   : > { %v1025_v10 = vpop.xlane.xlu1 %1024 }
 0x3dd   : > { %vm1130_vm1 = vcmp.eq.s32.totalorder %v1057_v41, 64  ;;  %v1026_v45 = vcvt.f32.s32 %v1025_v10 }
 0x3de   : > { %v1461_v33 = vsel %vm1130_vm1, 1.0, %v1659_v26 }
 0x3df   : > { %v1154_v46 = vmul.f32 %v1461_v33, %v2096_v21  ;;  %v1029_v17 = vadd.s32 %v1028_v31, %v1026_v45  ;;  %v1111_v21 = vcvt.f32.s32 %v2123_v61 }
 0x3e0   : > { %v1067_v48 = vpop.xlane.xlu0 %1066 }
 0x3e1   : > { %v2153_v23 = vmul.f32 %v2145_v44, %v1154_v46  ;;  %v2156_v27 = vmul.f32 %v2147_v14, %v1154_v46  ;;  %vm1128_vm2 = vcmp.eq.s32.totalorder %v1029_v17, 64  ;;  %v1068_v19 = vcvt.f32.s32 %v1067_v48 }
 0x3e2   : > { %v1459_v22 = vsel %vm1128_vm2, 1.0, %v1659_v26  ;;  %v1112_v42 = vshll.u32 %v1111_v21, 16 }
 0x3e3   : > { %v1152_v12 = vmul.f32 %v1459_v22, %v2099_v7  ;;  %v1071_v32 = vadd.s32 %v1070_v49, %v1068_v19  ;;  %v1083_v7 = vcvt.f32.s32 %v2126_v1 }
 0x3e4   : > { %v1039_v52 = vpop.xlane.xlu1 %1038 }
 0x3e5   : > { %v2162_v53 = vmul.f32 %v2145_v44, %v1152_v12  ;;  %v2165_v54 = vmul.f32 %v2147_v14, %v1152_v12  ;;  %vm1131_vm9 = vcmp.eq.s32.totalorder %v1071_v32, 64  ;;  %v1040_v55 = vcvt.f32.s32 %v1039_v52 }
 0x3e6   : > { %v1462_v56 = vsel %vm1131_vm9, 1.0, %v1659_v26  ;;  %v1084_v63 = vshll.u32 %v1083_v7, 16 }
 0x3e7   : > { %v1155_v39 = vmul.f32 %v1462_v56, %v2102_v37  ;;  %v1043_v57 = vadd.s32 %v1042_v51, %v1040_v55  ;;  %v1097_v37 = vcvt.f32.s32 %v2129_v6 }
 0x3e8   : > { %v1109_v34 = vpop.xlane.xlu1 %1108 }
 0x3e9   : > { %v2171_v35 = vmul.f32 %v2145_v44, %v1155_v39  ;;  %v2174_v58 = vmul.f32 %v2147_v14, %v1155_v39  ;;  %vm1129_vm10 = vcmp.eq.s32.totalorder %v1043_v57, 64  ;;  %v1110_v59 = vcvt.f32.s32 %v1109_v34 }
 0x3ea   : > { %v1460_v60 = vsel %vm1129_vm10, 1.0, %v1659_v26  ;;  %v1098_v13 = vshll.u32 %v1097_v37, 16 }
 0x3eb   : > { %v1153_v61 = vmul.f32 %v1460_v60, %v2105_v43  ;;  %v1113_v62 = vadd.s32 %v1112_v42, %v1110_v59  ;;  %v1125_v43 = vcvt.f32.s32 %v2132_v15 }
 0x3ec   : > { %v1081_v0 = vpop.xlane.xlu1 %1080 }
 0x3ed   : > { %v2180_v1 = vmul.f32 %v2145_v44, %v1153_v61  ;;  %v2183_v2 = vmul.f32 %v2147_v14, %v1153_v61  ;;  %vm1134_vm11 = vcmp.eq.s32.totalorder %v1113_v62, 64  ;;  %v1082_v3 = vcvt.f32.s32 %v1081_v0 }
 0x3ee   : > { %v1465_v4 = vsel %vm1134_vm11, 1.0, %v1659_v26  ;;  %v1126_v20 = vshll.u32 %v1125_v43, 16 }
 0x3ef   : > { %v1158_v11 = vmul.f32 %v1465_v4, %v2108_v47  ;;  %v1085_v5 = vadd.s32 %v1084_v63, %v1082_v3 }
 0x3f0   : > { %v1095_v25 = vpop.xlane.xlu1 %1094 }
 0x3f1   : > { %v2189_v6 = vmul.f32 %v2145_v44, %v1158_v11  ;;  %v2192_v28 = vmul.f32 %v2147_v14, %v1158_v11  ;;  %vm1132_vm12 = vcmp.eq.s32.totalorder %v1085_v5, 64  ;;  %v1096_v30 = vcvt.f32.s32 %v1095_v25 }
 0x3f2   : > { %v1463_v36 = vsel %vm1132_vm12, 1.0, %v1659_v26 }
 0x3f3   : > { %v1156_v8 = vmul.f32 %v1463_v36, %v2111_v16  ;;  %v1099_v38 = vadd.s32 %v1098_v13, %v1096_v30 }
 0x3f4   : > { %v1123_v47 = vpop.xlane.xlu1 %1122 }
 0x3f5   : > { %v2197_v40 = vmul.f32 %v2145_v44, %v1156_v8  ;;  %v2200_v15 = vmul.f32 %v2147_v14, %v1156_v8  ;;  %vm1133_vm13 = vcmp.eq.s32.totalorder %v1099_v38, 64  ;;  %v1124_v9 = vcvt.f32.s32 %v1123_v47 }
 0x3f6   : > { %v1464_v41 = vsel %vm1133_vm13, 1.0, %v1659_v26 }
 0x3f7   : > { %v1157_v18 = vmul.f32 %v1464_v41, %v2114_v29  ;;  %v1127_v10 = vadd.s32 %v1126_v20, %v1124_v9 }
 0x3f9   : > { %v2205_v31 = vmul.f32 %v2145_v44, %v1157_v18  ;;  %v2208_v16 = vmul.f32 %v2147_v14, %v1157_v18  ;;  %vm1135_vm14 = vcmp.eq.s32.totalorder %v1127_v10, 64  ;;  %1192 = sbr.rel (%p1467_p1) target bundleno = 1033 (0x409), region = 48 }
 0x3fa   : > { %v1466_v45 = vsel %vm1135_vm14, 1.0, %v1659_v26 }
 0x3fb   : > { %v1159_v33 = vmul.f32 %v1466_v45, %v2117_v24 }
 0x3fd   : > { %v2213_v46 = vmul.f32 %v2145_v44, %v1159_v33  ;;  %v2216_v17 = vmul.f32 %v2147_v14, %v1159_v33 }
 0x3fe   : > { %v1193_v29 = vld [vmem:[%s1756_s1] sm:$0xff]  ;;  %v1194_v24 = vld [vmem:[%s1756_s1 + $0x8] sm:$0xff]  ;;  %v1195_v44 = vld [vmem:[%s1756_s1 + $0x10] sm:$0xff] }
 0x3ff   : > { %v1209_v14 = vmax.f32 %v1193_v29, %v2162_v53  ;;  %v1210_v26 = vmax.f32 %v1194_v24, %v2165_v54  ;;  %v1211_v49 = vmax.f32 %v1195_v44, %v2180_v1  ;;  %v1196_v50 = vld [vmem:[%s1756_s1 + $0x18] sm:$0xff]  ;;  %v1197_v48 = vld [vmem:[%s1756_s1 + $0x20] sm:$0xff]  ;;  %v1198_v19 = vld [vmem:[%s1756_s1 + $0x28] sm:$0xff] }
 0x400   : > { %v1212_v22 = vmax.f32 %v1196_v50, %v2183_v2  ;;  %v1213_v12 = vmax.f32 %v1197_v48, %v2153_v23  ;;  %v1214_v32 = vmax.f32 %v1198_v19, %v2156_v27  ;;  %v1199_v51 = vld [vmem:[%s1756_s1 + $0x30] sm:$0xff]  ;;  %v1200_v21 = vld [vmem:[%s1756_s1 + $0x38] sm:$0xff]  ;;  %v1201_v52 = vld [vmem:[%s1756_s1 + $0x40] sm:$0xff] }
 0x401   : > { %1225 = vst [vmem:[%s1765_s29] sm:$0xff] %v1209_v14  ;;  %1226 = vst [vmem:[%s1765_s29 + $0x8] sm:$0xff] %v1210_v26  ;;  %v1215_v55 = vmax.f32 %v1199_v51, %v2171_v35  ;;  %v1216_v56 = vmax.f32 %v1200_v21, %v2174_v58  ;;  %v1217_v39 = vmax.f32 %v1201_v52, %v2197_v40  ;;  %v1202_v57 = vld [vmem:[%s1756_s1 + $0x48] sm:$0xff]  ;;  %v1203_v42 = vld [vmem:[%s1756_s1 + $0x50] sm:$0xff] }
 0x402   : > { %1227 = vst [vmem:[%s1765_s29 + $0x10] sm:$0xff] %v1211_v49  ;;  %v1204_v7 = vld [vmem:[%s1756_s1 + $0x58] sm:$0xff]  ;;  %1228 = vst [vmem:[%s1765_s29 + $0x18] sm:$0xff] %v1212_v22  ;;  %v1218_v34 = vmax.f32 %v1202_v57, %v2200_v15  ;;  %v1219_v59 = vmax.f32 %v1203_v42, %v2205_v31  ;;  %v1205_v61 = vld [vmem:[%s1756_s1 + $0x60] sm:$0xff] }
 0x403   : > { %1229 = vst [vmem:[%s1765_s29 + $0x20] sm:$0xff] %v1213_v12  ;;  %1230 = vst [vmem:[%s1765_s29 + $0x28] sm:$0xff] %v1214_v32  ;;  %v1220_v60 = vmax.f32 %v1204_v7, %v2208_v16  ;;  %v1206_v62 = vld [vmem:[%s1756_s1 + $0x68] sm:$0xff]  ;;  %v1207_v63 = vld [vmem:[%s1756_s1 + $0x70] sm:$0xff]  ;;  %v1221_v37 = vmax.f32 %v1205_v61, %v2189_v6 }
 0x404   : > { %1231 = vst [vmem:[%s1765_s29 + $0x30] sm:$0xff] %v1215_v55  ;;  %1232 = vst [vmem:[%s1765_s29 + $0x38] sm:$0xff] %v1216_v56  ;;  %v1222_v0 = vmax.f32 %v1206_v62, %v2192_v28  ;;  %v1223_v3 = vmax.f32 %v1207_v63, %v2213_v46  ;;  %v1208_v4 = vld [vmem:[%s1756_s1 + $0x78] sm:$0xff] }
 0x405   : > { %1233 = vst [vmem:[%s1765_s29 + $0x40] sm:$0xff] %v1217_v39  ;;  %1234 = vst [vmem:[%s1765_s29 + $0x48] sm:$0xff] %v1218_v34  ;;  %v1224_v11 = vmax.f32 %v1208_v4, %v2216_v17 }
 0x406   : > { %1235 = vst [vmem:[%s1765_s29 + $0x50] sm:$0xff] %v1219_v59  ;;  %1236 = vst [vmem:[%s1765_s29 + $0x58] sm:$0xff] %v1220_v60 }
 0x407   : > { %1237 = vst [vmem:[%s1765_s29 + $0x60] sm:$0xff] %v1221_v37  ;;  %1238 = vst [vmem:[%s1765_s29 + $0x68] sm:$0xff] %v1222_v0 }
 0x408   : > { %1239 = vst [vmem:[%s1765_s29 + $0x70] sm:$0xff] %v1223_v3  ;;  %1240 = vst [vmem:[%s1765_s29 + $0x78] sm:$0xff] %v1224_v11 }
 0x409 PF: > { %s1241_s19 = sld [smem:[#allocation6 + %s1738_s15]] }
 0x40f   : > { %p1468_p2 = scmp.ne.s32.totalorder %s1241_s19, 0 }
 0x411   : > { %1245 = sbr.rel (%p1468_p2) target bundleno = 1057 (0x421), region = 52 }
 0x416   : > { %v1246_v5 = vld [vmem:[%s1765_s29] sm:$0xff]  ;;  %v1247_v13 = vld [vmem:[%s1765_s29 + $0x8] sm:$0xff]  ;;  %v1248_v43 = vld [vmem:[%s1765_s29 + $0x10] sm:$0xff] }
 0x417   : > { %v1262_v25 = vmax.f32 %v1246_v5, %v2162_v53  ;;  %v1263_v30 = vmax.f32 %v1247_v13, %v2165_v54  ;;  %v1264_v36 = vmax.f32 %v1248_v43, %v2180_v1  ;;  %v1249_v8 = vld [vmem:[%s1765_s29 + $0x18] sm:$0xff]  ;;  %v1250_v38 = vld [vmem:[%s1765_s29 + $0x20] sm:$0xff]  ;;  %v1251_v20 = vld [vmem:[%s1765_s29 + $0x28] sm:$0xff] }
 0x418   : > { %v1265_v47 = vmax.f32 %v1249_v8, %v2183_v2  ;;  %v1266_v9 = vmax.f32 %v1250_v38, %v2153_v23  ;;  %v1267_v41 = vmax.f32 %v1251_v20, %v2156_v27  ;;  %v1252_v53 = vld [vmem:[%s1765_s29 + $0x30] sm:$0xff]  ;;  %v1253_v18 = vld [vmem:[%s1765_s29 + $0x38] sm:$0xff]  ;;  %v1254_v54 = vld [vmem:[%s1765_s29 + $0x40] sm:$0xff] }
 0x419   : > { %1278 = vst [vmem:[%s1765_s29] sm:$0xff] %v1262_v25  ;;  %1279 = vst [vmem:[%s1765_s29 + $0x8] sm:$0xff] %v1263_v30  ;;  %v1268_v1 = vmax.f32 %v1252_v53, %v2171_v35  ;;  %v1269_v2 = vmax.f32 %v1253_v18, %v2174_v58  ;;  %v1270_v23 = vmax.f32 %v1254_v54, %v2197_v40  ;;  %v1255_v10 = vld [vmem:[%s1765_s29 + $0x48] sm:$0xff]  ;;  %v1256_v27 = vld [vmem:[%s1765_s29 + $0x50] sm:$0xff] }
 0x41a   : > { %1280 = vst [vmem:[%s1765_s29 + $0x10] sm:$0xff] %v1264_v36  ;;  %v1257_v45 = vld [vmem:[%s1765_s29 + $0x58] sm:$0xff]  ;;  %1281 = vst [vmem:[%s1765_s29 + $0x18] sm:$0xff] %v1265_v47  ;;  %v1271_v33 = vmax.f32 %v1255_v10, %v2200_v15  ;;  %v1272_v35 = vmax.f32 %v1256_v27, %v2205_v31  ;;  %v1258_v29 = vld [vmem:[%s1765_s29 + $0x60] sm:$0xff] }
 0x41b   : > { %1282 = vst [vmem:[%s1765_s29 + $0x20] sm:$0xff] %v1266_v9  ;;  %1283 = vst [vmem:[%s1765_s29 + $0x28] sm:$0xff] %v1267_v41  ;;  %v1273_v58 = vmax.f32 %v1257_v45, %v2208_v16  ;;  %v1259_v40 = vld [vmem:[%s1765_s29 + $0x68] sm:$0xff]  ;;  %v1260_v24 = vld [vmem:[%s1765_s29 + $0x70] sm:$0xff]  ;;  %v1274_v44 = vmax.f32 %v1258_v29, %v2189_v6 }
 0x41c   : > { %1284 = vst [vmem:[%s1765_s29 + $0x30] sm:$0xff] %v1268_v1  ;;  %1285 = vst [vmem:[%s1765_s29 + $0x38] sm:$0xff] %v1269_v2  ;;  %v1275_v14 = vmax.f32 %v1259_v40, %v2192_v28  ;;  %v1276_v15 = vmax.f32 %v1260_v24, %v2213_v46  ;;  %v1261_v26 = vld [vmem:[%s1765_s29 + $0x78] sm:$0xff] }
 0x41d   : > { %1286 = vst [vmem:[%s1765_s29 + $0x40] sm:$0xff] %v1270_v23  ;;  %1287 = vst [vmem:[%s1765_s29 + $0x48] sm:$0xff] %v1271_v33  ;;  %v1277_v31 = vmax.f32 %v1261_v26, %v2216_v17 }
 0x41e   : > { %1288 = vst [vmem:[%s1765_s29 + $0x50] sm:$0xff] %v1272_v35  ;;  %1289 = vst [vmem:[%s1765_s29 + $0x58] sm:$0xff] %v1273_v58 }
 0x41f   : > { %1290 = vst [vmem:[%s1765_s29 + $0x60] sm:$0xff] %v1274_v44  ;;  %1291 = vst [vmem:[%s1765_s29 + $0x68] sm:$0xff] %v1275_v14 }
 0x420   : > { %1292 = vst [vmem:[%s1765_s29 + $0x70] sm:$0xff] %v1276_v15  ;;  %1293 = vst [vmem:[%s1765_s29 + $0x78] sm:$0xff] %v1277_v31 }
 0x421 PF: > { %s40_s3 = sadd.s32 1, %s1653_s3  }
 0x422   : > { %p37_p3 = scmp.ge.s32.totalorder %s40_s3, 5  }
 0x424   :  { %39 = sbr.rel (!%p37_p3) target bundleno = 47 (0x2f), region = 103 }

</bundles_post_ra>
